<compile_context>
chip_gen: v7x
topology: tpu7x:2x2x1
jax: 0.10.0
libtpu: 0.0.40
codegen_flags: <defaults>
</compile_context>

<pallas_src>
import functools

import jax
import jax.numpy as jnp
from jax import lax
from jax.experimental import pallas as pl
from jax.experimental.pallas import tpu as pltpu


def _round_up(n, m):
    return ((n + m - 1) // m) * m


# ----------------------------------------------------------------------------
# Pallas kernels: matmul + bias + fused activation, bf16 out.
# ----------------------------------------------------------------------------
def _apply_act(y, activation):
    if activation == "leaky_relu":
        return jnp.where(y > 0, y, 0.2 * y)
    if activation == "relu":
        return jnp.maximum(y, 0.0)
    if activation == "tanh":
        return jnp.tanh(y)
    if activation == "none":
        return y
    raise ValueError(activation)


def _mm_kres_kernel(p_ref, w_ref, b_ref, o_ref, *, activation):
    # Whole K resident: one MXU dot per M tile, f32 accumulate, f32 epilogue.
    acc = jnp.dot(p_ref[...], w_ref[...], preferred_element_type=jnp.float32)
    acc = acc + b_ref[...]
    o_ref[...] = _apply_act(acc, activation).astype(o_ref.dtype)


def _mm_ktiled_kernel(p_ref, w_ref, b_ref, o_ref, acc_ref, *, activation):
    # Fallback for large K: accumulate in an f32 VMEM scratch, bf16 epilogue.
    k = pl.program_id(1)

    @pl.when(k == 0)
    def _():
        acc_ref[...] = jnp.broadcast_to(b_ref[...], acc_ref.shape)

    acc_ref[...] += jnp.dot(p_ref[...], w_ref[...],
                            preferred_element_type=jnp.float32)

    @pl.when(k == pl.num_programs(1) - 1)
    def _():
        o_ref[...] = _apply_act(acc_ref[...], activation).astype(o_ref.dtype)


def matmul_bias_act(patches, packed, activation):
    """patches: (P, K) bf16; packed weight (Kp, Cp) bf16, bias (1, Cp) f32.

    Returns (P, Cout) bf16 with bias + activation fused.
    """
    P, K = patches.shape
    Kp, Cp = packed["w_p"].shape
    Cout = packed["cout"]

    tm = _round_up(P, 16) if P <= 1024 else 1024   # bf16-friendly M tile
    Mp = _round_up(P, tm)

    patches_p = patches.astype(jnp.bfloat16)
    if (Mp, Kp) != (P, K):
        patches_p = jnp.pad(patches_p, ((0, Mp - P), (0, Kp - K)))

    w_p, b_p = packed["w_p"], packed["b_p"]
    w_bytes = Kp * Cp * 2

    if w_bytes <= (6 << 20):
        # --- K-resident single-dot path (always taken for this network). ---
        vmem_need = (2 * tm * Kp * 2      # double-buffered bf16 patch blocks
                     + 2 * w_bytes        # resident bf16 weight
                     + 2 * tm * Cp * 2    # double-buffered bf16 output blocks
                     + 2 * Cp * 4)        # bias
        vmem_limit = int(min(48 << 20, max(4 * vmem_need, 8 << 20)))
        out = pl.pallas_call(
            functools.partial(_mm_kres_kernel, activation=activation),
            out_shape=jax.ShapeDtypeStruct((Mp, Cp), jnp.bfloat16),
            grid_spec=pltpu.PrefetchScalarGridSpec(
                num_scalar_prefetch=0,
                grid=(Mp // tm,),
                in_specs=[
                    pl.BlockSpec((tm, Kp), lambda i: (i, 0)),
                    pl.BlockSpec((Kp, Cp), lambda i: (0, 0)),   # stays resident
                    pl.BlockSpec((1, Cp), lambda i: (0, 0)),
                ],
                out_specs=pl.BlockSpec((tm, Cp), lambda i: (i, 0)),
            ),
            compiler_params=pltpu.CompilerParams(
                dimension_semantics=("parallel",),
                vmem_limit_bytes=vmem_limit),
        )(patches_p, w_p, b_p)
    else:
        # --- K-tiled fallback (large hidden_dim). Reduction axis last. ---
        tk = 512 if Kp % 512 == 0 else (256 if Kp % 256 == 0 else 128)
        vmem_need = (2 * tm * tk * 2 + 2 * tk * Cp * 2 + 2 * tm * Cp * 2
                     + tm * Cp * 4 + 2 * Cp * 4)
        vmem_limit = int(min(48 << 20, max(4 * vmem_need, 8 << 20)))
        out = pl.pallas_call(
            functools.partial(_mm_ktiled_kernel, activation=activation),
            out_shape=jax.ShapeDtypeStruct((Mp, Cp), jnp.bfloat16),
            grid_spec=pltpu.PrefetchScalarGridSpec(
                num_scalar_prefetch=0,
                grid=(Mp // tm, Kp // tk),
                in_specs=[
                    pl.BlockSpec((tm, tk), lambda i, k: (i, k)),
                    pl.BlockSpec((tk, Cp), lambda i, k: (k, 0)),
                    pl.BlockSpec((1, Cp), lambda i, k: (0, 0)),
                ],
                out_specs=pl.BlockSpec((tm, Cp), lambda i, k: (i, 0)),
                scratch_shapes=[pltpu.VMEM((tm, Cp), jnp.float32)],
            ),
            compiler_params=pltpu.CompilerParams(
                dimension_semantics=("parallel", "arbitrary"),
                vmem_limit_bytes=vmem_limit),
        )(patches_p, w_p, b_p)

    return out[:P, :Cout]


# ----------------------------------------------------------------------------
# Parameter packing (done ONCE, outside the per-forward path).
# ----------------------------------------------------------------------------
def pack_conv(w, b):
    """w: (Cout, Cin, kh, kw) (PyTorch Conv2d layout), b: (Cout,)."""
    Cout, Cin, kh, kw = w.shape
    K = kh * kw * Cin
    Kp, Cp = _round_up(K, 128), _round_up(Cout, 128)
    w_mat = jnp.transpose(w, (2, 3, 1, 0)).reshape(K, Cout)
    w_p = jnp.pad(w_mat, ((0, Kp - K), (0, Cp - Cout))).astype(jnp.bfloat16)
    b_p = jnp.pad(b.astype(jnp.float32), (0, Cp - Cout)).reshape(1, Cp)
    return {"w_p": w_p, "b_p": b_p, "cout": Cout, "kh": kh, "kw": kw}


def pack_deconv(w, b):
    """w: (Cin, Cout, 4, 4) (PyTorch ConvTranspose2d layout), b: (Cout,).

    Packs all 4 sub-pixel phases of the k=4,s=2,p=1 deconv into a single
    (9*Cin, 4*Cout) weight over a shared 3x3 stride-1 im2col of the (pad-1)
    input: phase (rh, rw) at output (i, j) reads tap (rh+di, rw+dj) of the 3x3
    window and multiplies by w[ci, co, 3-rh-2*di, 3-rw-2*dj].
    """
    Cin, Cout = int(w.shape[0]), int(w.shape[1])
    wp = jnp.zeros((3, 3, Cin, 4, Cout), jnp.float32)
    for rh in (0, 1):
        for rw in (0, 1):
            for di in (0, 1):
                for dj in (0, 1):
                    wp = wp.at[rh + di, rw + dj, :, rh * 2 + rw, :].set(
                        w[:, :, 3 - rh - 2 * di, 3 - rw - 2 * dj])
    K, C4 = 9 * Cin, 4 * Cout
    Kp, Cp = _round_up(K, 128), _round_up(C4, 128)
    w_mat = wp.reshape(K, C4)
    w_p = jnp.pad(w_mat, ((0, Kp - K), (0, Cp - C4))).astype(jnp.bfloat16)
    b_p = jnp.pad(jnp.tile(b.astype(jnp.float32), 4), (0, Cp - C4)).reshape(1, Cp)
    return {"w_p": w_p, "b_p": b_p, "cout": C4, "kh": 3, "kw": 3,
            "cout_base": Cout}


def pack_params(params):
    return {
        "enc": [pack_conv(w, b) for (w, b) in params["enc"]],
        "dec": [pack_deconv(w, b) for (w, b) in params["dec"]],
        "last": pack_conv(*params["last"]),
    }


# ----------------------------------------------------------------------------
# NHWC bf16 conv / deconv built on the Pallas matmul.
# ----------------------------------------------------------------------------
def conv2d_nhwc(x, packed, stride, pad, activation):
    """x: (N, H, W, Cin) bf16 NHWC -> (N, Ho, Wo, Cout) bf16."""
    N, H, W, Cin = x.shape
    kh, kw = packed["kh"], packed["kw"]
    Ho = (H + 2 * pad - kh) // stride + 1
    Wo = (W + 2 * pad - kw) // stride + 1
    x_pad = jnp.pad(x, ((0, 0), (pad, pad), (pad, pad), (0, 0)))
    cols = [x_pad[:, ih:ih + stride * Ho:stride, iw:iw + stride * Wo:stride, :]
            for ih in range(kh) for iw in range(kw)]
    patches = jnp.stack(cols, axis=3).reshape(N * Ho * Wo, kh * kw * Cin)
    out = matmul_bias_act(patches, packed, activation)
    return out.reshape(N, Ho, Wo, packed["cout"])


def conv_transpose2d_nhwc(x, packed, activation):
    """ConvTranspose2d(k=4, s=2, p=1) as ONE pallas_call + pixel shuffle."""
    N, H, W, Cin = x.shape
    Cout = packed["cout_base"]
    x_pad = jnp.pad(x, ((0, 0), (1, 1), (1, 1), (0, 0)))
    cols = [x_pad[:, th:th + H, tw:tw + W, :]
            for th in range(3) for tw in range(3)]
    patches = jnp.stack(cols, axis=3).reshape(N * H * W, 9 * Cin)
    y = matmul_bias_act(patches, packed, activation)       # (N*H*W, 4*Cout)
    y = y.reshape(N, H, W, 2, 2, Cout)                      # (.., rh, rw, co)
    y = jnp.transpose(y, (0, 1, 3, 2, 4, 5)).reshape(N, 2 * H, 2 * W, Cout)
    return y


# ----------------------------------------------------------------------------
# Parameter initialization (deterministic, PyTorch-like uniform bounds).
# ----------------------------------------------------------------------------
def init_params(key, blocks_num, hidden_dim):
    def uniform(key, shape, fan_in):
        bound = 1.0 / jnp.sqrt(jnp.float32(fan_in))
        return jax.random.uniform(key, shape, jnp.float32, -bound, bound)

    params = {"enc": [], "dec": []}

    in_c = 3
    for _ in range(blocks_num):
        key, kw_, kb_ = jax.random.split(key, 3)
        fan_in = in_c * 4 * 4
        w = uniform(kw_, (hidden_dim, in_c, 4, 4), fan_in)
        b = uniform(kb_, (hidden_dim,), fan_in)
        params["enc"].append((w, b))
        in_c = hidden_dim

    for i in range(blocks_num):
        in_c = hidden_dim if i == 0 else hidden_dim * 2
        key, kw_, kb_ = jax.random.split(key, 3)
        fan_in = hidden_dim * 4 * 4   # ConvTranspose2d fan_in = weight.size(1)*kh*kw
        w = uniform(kw_, (in_c, hidden_dim, 4, 4), fan_in)
        b = uniform(kb_, (hidden_dim,), fan_in)
        params["dec"].append((w, b))

    key, kw_, kb_ = jax.random.split(key, 3)
    fan_in = hidden_dim * 3 * 3
    params["last"] = (uniform(kw_, (3, hidden_dim, 3, 3), fan_in),
                      uniform(kb_, (3,), fan_in))
    return params


# ----------------------------------------------------------------------------
# Pix2PixUNet forward (Pallas) and a pure-JAX reference for validation.
# ----------------------------------------------------------------------------
def pix2pix_unet_forward(packed_params, x_nchw, blocks_num):
    # NCHW f32 -> NHWC bf16 once; stay NHWC/bf16 end-to-end.
    x = jnp.transpose(x_nchw, (0, 2, 3, 1)).astype(jnp.bfloat16)

    encoded = []
    for p in packed_params["enc"]:
        x = conv2d_nhwc(x, p, stride=2, pad=1, activation="leaky_relu")
        encoded.append(x)

    # TODO(synk): Dropout is identity (inference semantics).
    x = conv_transpose2d_nhwc(x, packed_params["dec"][0], activation="relu")
    for i in range(1, blocks_num):
        xx = jnp.concatenate([x, encoded[blocks_num - 1 - i]], axis=-1)
        x = conv_transpose2d_nhwc(xx, packed_params["dec"][i], activation="relu")

    x = conv2d_nhwc(x, packed_params["last"], stride=1, pad=1, activation="tanh")
    return jnp.transpose(x, (0, 3, 1, 2)).astype(jnp.float32)


def _ref_conv(x, w, b, stride, padding, lhs_dilation=(1, 1)):
    y = lax.conv_general_dilated(
        x, w, window_strides=(stride, stride),
        padding=[(padding, padding), (padding, padding)],
        lhs_dilation=lhs_dilation,
        dimension_numbers=("NCHW", "OIHW", "NCHW"),
        precision=lax.Precision.HIGHEST)
    return y + b[None, :, None, None]


def pix2pix_unet_reference(params, x, blocks_num):
    encoded = []
    for (w, b) in params["enc"]:
        x = _ref_conv(x, w, b, 2, 1)
        x = jnp.where(x > 0, x, 0.2 * x)
        encoded.append(x)

    def dec(x, w, b):
        w_eq = jnp.transpose(w[:, :, ::-1, ::-1], (1, 0, 2, 3))
        y = _ref_conv(x, w_eq, b, 1, 2, lhs_dilation=(2, 2))
        return jnp.maximum(y, 0.0)

    w, b = params["dec"][0]
    x = dec(x, w, b)
    for i in range(1, blocks_num):
        xx = jnp.concatenate([x, encoded[blocks_num - 1 - i]], axis=1)
        w, b = params["dec"][i]
        x = dec(xx, w, b)

    w, b = params["last"]
    return jnp.tanh(_ref_conv(x, w, b, 1, 1))


# ----------------------------------------------------------------------------
if __name__ == "__main__":
    blocks_num = 2
    hidden_dim = 32
    N, H, W = 2, 16, 16

    key = jax.random.PRNGKey(0)
    key, kx = jax.random.split(key)
    x = jax.random.normal(kx, (N, 3, H, W), jnp.float32)

    params = init_params(key, blocks_num, hidden_dim)
    packed = pack_params(params)          # pad + bf16 cast hoisted out of forward

    fwd = jax.jit(lambda xx: pix2pix_unet_forward(packed, xx, blocks_num))
    out = jax.block_until_ready(fwd(x))

    assert out.shape == (N, 3, H, W), out.shape
    assert bool(jnp.all(jnp.isfinite(out)))

    # Intermediate check (first encoder block) so tanh saturation can't mask errors.
    x_nhwc = jnp.transpose(x, (0, 2, 3, 1)).astype(jnp.bfloat16)
    enc1 = conv2d_nhwc(x_nhwc, packed["enc"][0], stride=2, pad=1,
                       activation="leaky_relu")
    enc1 = jnp.transpose(enc1, (0, 3, 1, 2)).astype(jnp.float32)
    enc1_ref = _ref_conv(x, params["enc"][0][0], params["enc"][0][1], 2, 1)
    enc1_ref = jnp.where(enc1_ref > 0, enc1_ref, 0.2 * enc1_ref)
    enc1_err = float(jnp.max(jnp.abs(enc1 - enc1_ref)))
    assert enc1_err < 5e-2, enc1_err

    ref = jax.block_until_ready(pix2pix_unet_reference(params, x, blocks_num))
    max_err = float(jnp.max(jnp.abs(out - ref)))
    assert max_err < 5e-2, max_err       # bf16 activations/operands, f32 accumulate

    print("KERNEL_OK")
</pallas_src>

<mosaic_0001>
module attributes {stable_mosaic.version = 11 : i64} {
  func.func @_mm_kres_kernel(%arg0: i32, %arg1: memref<128x128xbf16, #tpu.memory_space<vmem>>, %arg2: memref<128x128xbf16, #tpu.memory_space<vmem>>, %arg3: memref<1x128xf32, #tpu.memory_space<vmem>>, %arg4: memref<128x128xbf16, #tpu.memory_space<vmem>>) attributes {dimension_semantics = [#tpu.dimension_semantics<parallel>], iteration_bounds = array<i64: 1>, scalar_prefetch = 0 : i64, scratch_operands = 0 : i64, tpu.core_type = #tpu.core_type<tc>, window_params = [{transform_indices = @transform_0, window_bounds = array<i64: 128, 128>}, {pipeline_mode = #tpu.pipeline_mode<synchronous>, transform_indices = @transform_1, window_bounds = array<i64: 128, 128>}, {pipeline_mode = #tpu.pipeline_mode<synchronous>, transform_indices = @transform_2, window_bounds = array<i64: 1, 128>}, {transform_indices = @transform_3, window_bounds = array<i64: 128, 128>}]} {
    %c0 = arith.constant 0 : index
    %c0_0 = arith.constant 0 : index
    %0 = vector.load %arg1[%c0, %c0_0] : memref<128x128xbf16, #tpu.memory_space<vmem>>, vector<128x128xbf16>
    %c0_1 = arith.constant 0 : index
    %c0_2 = arith.constant 0 : index
    %1 = vector.load %arg2[%c0_1, %c0_2] : memref<128x128xbf16, #tpu.memory_space<vmem>>, vector<128x128xbf16>
    %cst = arith.constant dense<0.000000e+00> : vector<128x128xf32>
    %2 = tpu.matmul %0, %1, %cst {dimension_numbers = #tpu.dot_dimension_numbers<[1], [0], [0], [1], [0, 0, 1, 1], [], []>} : vector<128x128xbf16>, vector<128x128xbf16>, vector<128x128xf32> -> vector<128x128xf32>
    %c0_3 = arith.constant 0 : index
    %c0_4 = arith.constant 0 : index
    %3 = vector.load %arg3[%c0_3, %c0_4] : memref<1x128xf32, #tpu.memory_space<vmem>>, vector<1x128xf32>
    %4 = vector.broadcast %3 : vector<1x128xf32> to vector<128x128xf32>
    %5 = arith.addf %2, %4 : vector<128x128xf32>
    %cst_5 = arith.constant 0.000000e+00 : f32
    %6 = vector.broadcast %cst_5 : f32 to vector<128x128xf32>
    %7 = arith.cmpf ogt, %5, %6 : vector<128x128xf32>
    %cst_6 = arith.constant 2.000000e-01 : f32
    %8 = vector.broadcast %cst_6 : f32 to vector<128x128xf32>
    %9 = arith.mulf %8, %5 : vector<128x128xf32>
    %10 = arith.select %7, %5, %9 : vector<128x128xi1>, vector<128x128xf32>
    %11 = arith.truncf %10 : vector<128x128xf32> to vector<128x128xbf16>
    %c0_7 = arith.constant 0 : index
    %c0_8 = arith.constant 0 : index
    %12 = vector.load %arg4[%c0_7, %c0_8] : memref<128x128xbf16, #tpu.memory_space<vmem>>, vector<128x128xbf16>
    tpu.vector_store %arg4[%c0_7, %c0_8], %11 {strides = array<i32>} : memref<128x128xbf16, #tpu.memory_space<vmem>>, vector<128x128xbf16>,
    return
  }
  func.func @transform_0(%arg0: i32) -> (i32, i32) {
    %c0_i32 = arith.constant 0 : i32
    %c0_i32_0 = arith.constant 0 : i32
    return %arg0, %c0_i32 : i32, i32
  }
  func.func @transform_1(%arg0: i32) -> (i32, i32) {
    %c0_i32 = arith.constant 0 : i32
    %c0_i32_0 = arith.constant 0 : i32
    %c0_i32_1 = arith.constant 0 : i32
    return %c0_i32, %c0_i32_0 : i32, i32
  }
  func.func @transform_2(%arg0: i32) -> (i32, i32) {
    %c0_i32 = arith.constant 0 : i32
    %c0_i32_0 = arith.constant 0 : i32
    %c0_i32_1 = arith.constant 0 : i32
    return %c0_i32, %c0_i32_0 : i32, i32
  }
  func.func @transform_3(%arg0: i32) -> (i32, i32) {
    %c0_i32 = arith.constant 0 : i32
    %c0_i32_0 = arith.constant 0 : i32
    return %arg0, %c0_i32 : i32, i32
  }
}

module attributes {stable_mosaic.version = 11 : i64} {
  func.func @_mm_kres_kernel(%arg0: i32, %arg1: memref<32x512xbf16, #tpu.memory_space<vmem>>, %arg2: memref<512x128xbf16, #tpu.memory_space<vmem>>, %arg3: memref<1x128xf32, #tpu.memory_space<vmem>>, %arg4: memref<32x128xbf16, #tpu.memory_space<vmem>>) attributes {dimension_semantics = [#tpu.dimension_semantics<parallel>], iteration_bounds = array<i64: 1>, scalar_prefetch = 0 : i64, scratch_operands = 0 : i64, tpu.core_type = #tpu.core_type<tc>, window_params = [{transform_indices = @transform_0, window_bounds = array<i64: 32, 512>}, {pipeline_mode = #tpu.pipeline_mode<synchronous>, transform_indices = @transform_1, window_bounds = array<i64: 512, 128>}, {pipeline_mode = #tpu.pipeline_mode<synchronous>, transform_indices = @transform_2, window_bounds = array<i64: 1, 128>}, {transform_indices = @transform_3, window_bounds = array<i64: 32, 128>}]} {
    %c0 = arith.constant 0 : index
    %c0_0 = arith.constant 0 : index
    %0 = vector.load %arg1[%c0, %c0_0] : memref<32x512xbf16, #tpu.memory_space<vmem>>, vector<32x512xbf16>
    %c0_1 = arith.constant 0 : index
    %c0_2 = arith.constant 0 : index
    %1 = vector.load %arg2[%c0_1, %c0_2] : memref<512x128xbf16, #tpu.memory_space<vmem>>, vector<512x128xbf16>
    %cst = arith.constant dense<0.000000e+00> : vector<32x128xf32>
    %2 = tpu.matmul %0, %1, %cst {dimension_numbers = #tpu.dot_dimension_numbers<[1], [0], [0], [1], [0, 0, 1, 1], [], []>} : vector<32x512xbf16>, vector<512x128xbf16>, vector<32x128xf32> -> vector<32x128xf32>
    %c0_3 = arith.constant 0 : index
    %c0_4 = arith.constant 0 : index
    %3 = vector.load %arg3[%c0_3, %c0_4] : memref<1x128xf32, #tpu.memory_space<vmem>>, vector<1x128xf32>
    %4 = vector.broadcast %3 : vector<1x128xf32> to vector<32x128xf32>
    %5 = arith.addf %2, %4 : vector<32x128xf32>
    %cst_5 = arith.constant 0.000000e+00 : f32
    %6 = vector.broadcast %cst_5 : f32 to vector<32x128xf32>
    %7 = arith.cmpf ogt, %5, %6 : vector<32x128xf32>
    %cst_6 = arith.constant 2.000000e-01 : f32
    %8 = vector.broadcast %cst_6 : f32 to vector<32x128xf32>
    %9 = arith.mulf %8, %5 : vector<32x128xf32>
    %10 = arith.select %7, %5, %9 : vector<32x128xi1>, vector<32x128xf32>
    %11 = arith.truncf %10 : vector<32x128xf32> to vector<32x128xbf16>
    %c0_7 = arith.constant 0 : index
    %c0_8 = arith.constant 0 : index
    %12 = vector.load %arg4[%c0_7, %c0_8] : memref<32x128xbf16, #tpu.memory_space<vmem>>, vector<32x128xbf16>
    tpu.vector_store %arg4[%c0_7, %c0_8], %11 {strides = array<i32>} : memref<32x128xbf16, #tpu.memory_space<vmem>>, vector<32x128xbf16>,
    return
  }
  func.func @transform_0(%arg0: i32) -> (i32, i32) {
    %c0_i32 = arith.constant 0 : i32
    %c0_i32_0 = arith.constant 0 : i32
    return %arg0, %c0_i32 : i32, i32
  }
  func.func @transform_1(%arg0: i32) -> (i32, i32) {
    %c0_i32 = arith.constant 0 : i32
    %c0_i32_0 = arith.constant 0 : i32
    %c0_i32_1 = arith.constant 0 : i32
    return %c0_i32, %c0_i32_0 : i32, i32
  }
  func.func @transform_2(%arg0: i32) -> (i32, i32) {
    %c0_i32 = arith.constant 0 : i32
    %c0_i32_0 = arith.constant 0 : i32
    %c0_i32_1 = arith.constant 0 : i32
    return %c0_i32, %c0_i32_0 : i32, i32
  }
  func.func @transform_3(%arg0: i32) -> (i32, i32) {
    %c0_i32 = arith.constant 0 : i32
    %c0_i32_0 = arith.constant 0 : i32
    return %arg0, %c0_i32 : i32, i32
  }
}

module attributes {stable_mosaic.version = 11 : i64} {
  func.func @_mm_kres_kernel(%arg0: i32, %arg1: memref<32x384xbf16, #tpu.memory_space<vmem>>, %arg2: memref<384x128xbf16, #tpu.memory_space<vmem>>, %arg3: memref<1x128xf32, #tpu.memory_space<vmem>>, %arg4: memref<32x128xbf16, #tpu.memory_space<vmem>>) attributes {dimension_semantics = [#tpu.dimension_semantics<parallel>], iteration_bounds = array<i64: 1>, scalar_prefetch = 0 : i64, scratch_operands = 0 : i64, tpu.core_type = #tpu.core_type<tc>, window_params = [{transform_indices = @transform_0, window_bounds = array<i64: 32, 384>}, {pipeline_mode = #tpu.pipeline_mode<synchronous>, transform_indices = @transform_1, window_bounds = array<i64: 384, 128>}, {pipeline_mode = #tpu.pipeline_mode<synchronous>, transform_indices = @transform_2, window_bounds = array<i64: 1, 128>}, {transform_indices = @transform_3, window_bounds = array<i64: 32, 128>}]} {
    %c0 = arith.constant 0 : index
    %c0_0 = arith.constant 0 : index
    %0 = vector.load %arg1[%c0, %c0_0] : memref<32x384xbf16, #tpu.memory_space<vmem>>, vector<32x384xbf16>
    %c0_1 = arith.constant 0 : index
    %c0_2 = arith.constant 0 : index
    %1 = vector.load %arg2[%c0_1, %c0_2] : memref<384x128xbf16, #tpu.memory_space<vmem>>, vector<384x128xbf16>
    %cst = arith.constant dense<0.000000e+00> : vector<32x128xf32>
    %2 = tpu.matmul %0, %1, %cst {dimension_numbers = #tpu.dot_dimension_numbers<[1], [0], [0], [1], [0, 0, 1, 1], [], []>} : vector<32x384xbf16>, vector<384x128xbf16>, vector<32x128xf32> -> vector<32x128xf32>
    %c0_3 = arith.constant 0 : index
    %c0_4 = arith.constant 0 : index
    %3 = vector.load %arg3[%c0_3, %c0_4] : memref<1x128xf32, #tpu.memory_space<vmem>>, vector<1x128xf32>
    %4 = vector.broadcast %3 : vector<1x128xf32> to vector<32x128xf32>
    %5 = arith.addf %2, %4 : vector<32x128xf32>
    %cst_5 = arith.constant 0.000000e+00 : f32
    %6 = vector.broadcast %cst_5 : f32 to vector<32x128xf32>
    %7 = arith.maximumf %5, %6 : vector<32x128xf32>
    %8 = arith.truncf %7 : vector<32x128xf32> to vector<32x128xbf16>
    %c0_6 = arith.constant 0 : index
    %c0_7 = arith.constant 0 : index
    %9 = vector.load %arg4[%c0_6, %c0_7] : memref<32x128xbf16, #tpu.memory_space<vmem>>, vector<32x128xbf16>
    tpu.vector_store %arg4[%c0_6, %c0_7], %8 {strides = array<i32>} : memref<32x128xbf16, #tpu.memory_space<vmem>>, vector<32x128xbf16>,
    return
  }
  func.func @transform_0(%arg0: i32) -> (i32, i32) {
    %c0_i32 = arith.constant 0 : i32
    %c0_i32_0 = arith.constant 0 : i32
    return %arg0, %c0_i32 : i32, i32
  }
  func.func @transform_1(%arg0: i32) -> (i32, i32) {
    %c0_i32 = arith.constant 0 : i32
    %c0_i32_0 = arith.constant 0 : i32
    %c0_i32_1 = arith.constant 0 : i32
    return %c0_i32, %c0_i32_0 : i32, i32
  }
  func.func @transform_2(%arg0: i32) -> (i32, i32) {
    %c0_i32 = arith.constant 0 : i32
    %c0_i32_0 = arith.constant 0 : i32
    %c0_i32_1 = arith.constant 0 : i32
    return %c0_i32, %c0_i32_0 : i32, i32
  }
  func.func @transform_3(%arg0: i32) -> (i32, i32) {
    %c0_i32 = arith.constant 0 : i32
    %c0_i32_0 = arith.constant 0 : i32
    return %arg0, %c0_i32 : i32, i32
  }
}

module attributes {stable_mosaic.version = 11 : i64} {
  func.func @_mm_kres_kernel(%arg0: i32, %arg1: memref<128x640xbf16, #tpu.memory_space<vmem>>, %arg2: memref<640x128xbf16, #tpu.memory_space<vmem>>, %arg3: memref<1x128xf32, #tpu.memory_space<vmem>>, %arg4: memref<128x128xbf16, #tpu.memory_space<vmem>>) attributes {dimension_semantics = [#tpu.dimension_semantics<parallel>], iteration_bounds = array<i64: 1>, scalar_prefetch = 0 : i64, scratch_operands = 0 : i64, tpu.core_type = #tpu.core_type<tc>, window_params = [{transform_indices = @transform_0, window_bounds = array<i64: 128, 640>}, {pipeline_mode = #tpu.pipeline_mode<synchronous>, transform_indices = @transform_1, window_bounds = array<i64: 640, 128>}, {pipeline_mode = #tpu.pipeline_mode<synchronous>, transform_indices = @transform_2, window_bounds = array<i64: 1, 128>}, {transform_indices = @transform_3, window_bounds = array<i64: 128, 128>}]} {
    %c0 = arith.constant 0 : index
    %c0_0 = arith.constant 0 : index
    %0 = vector.load %arg1[%c0, %c0_0] : memref<128x640xbf16, #tpu.memory_space<vmem>>, vector<128x640xbf16>
    %c0_1 = arith.constant 0 : index
    %c0_2 = arith.constant 0 : index
    %1 = vector.load %arg2[%c0_1, %c0_2] : memref<640x128xbf16, #tpu.memory_space<vmem>>, vector<640x128xbf16>
    %cst = arith.constant dense<0.000000e+00> : vector<128x128xf32>
    %2 = tpu.matmul %0, %1, %cst {dimension_numbers = #tpu.dot_dimension_numbers<[1], [0], [0], [1], [0, 0, 1, 1], [], []>} : vector<128x640xbf16>, vector<640x128xbf16>, vector<128x128xf32> -> vector<128x128xf32>
    %c0_3 = arith.constant 0 : index
    %c0_4 = arith.constant 0 : index
    %3 = vector.load %arg3[%c0_3, %c0_4] : memref<1x128xf32, #tpu.memory_space<vmem>>, vector<1x128xf32>
    %4 = vector.broadcast %3 : vector<1x128xf32> to vector<128x128xf32>
    %5 = arith.addf %2, %4 : vector<128x128xf32>
    %cst_5 = arith.constant 0.000000e+00 : f32
    %6 = vector.broadcast %cst_5 : f32 to vector<128x128xf32>
    %7 = arith.maximumf %5, %6 : vector<128x128xf32>
    %8 = arith.truncf %7 : vector<128x128xf32> to vector<128x128xbf16>
    %c0_6 = arith.constant 0 : index
    %c0_7 = arith.constant 0 : index
    %9 = vector.load %arg4[%c0_6, %c0_7] : memref<128x128xbf16, #tpu.memory_space<vmem>>, vector<128x128xbf16>
    tpu.vector_store %arg4[%c0_6, %c0_7], %8 {strides = array<i32>} : memref<128x128xbf16, #tpu.memory_space<vmem>>, vector<128x128xbf16>,
    return
  }
  func.func @transform_0(%arg0: i32) -> (i32, i32) {
    %c0_i32 = arith.constant 0 : i32
    %c0_i32_0 = arith.constant 0 : i32
    return %arg0, %c0_i32 : i32, i32
  }
  func.func @transform_1(%arg0: i32) -> (i32, i32) {
    %c0_i32 = arith.constant 0 : i32
    %c0_i32_0 = arith.constant 0 : i32
    %c0_i32_1 = arith.constant 0 : i32
    return %c0_i32, %c0_i32_0 : i32, i32
  }
  func.func @transform_2(%arg0: i32) -> (i32, i32) {
    %c0_i32 = arith.constant 0 : i32
    %c0_i32_0 = arith.constant 0 : i32
    %c0_i32_1 = arith.constant 0 : i32
    return %c0_i32, %c0_i32_0 : i32, i32
  }
  func.func @transform_3(%arg0: i32) -> (i32, i32) {
    %c0_i32 = arith.constant 0 : i32
    %c0_i32_0 = arith.constant 0 : i32
    return %arg0, %c0_i32 : i32, i32
  }
}

module attributes {stable_mosaic.version = 11 : i64} {
  func.func @_mm_kres_kernel(%arg0: i32, %arg1: memref<512x384xbf16, #tpu.memory_space<vmem>>, %arg2: memref<384x128xbf16, #tpu.memory_space<vmem>>, %arg3: memref<1x128xf32, #tpu.memory_space<vmem>>, %arg4: memref<512x128xbf16, #tpu.memory_space<vmem>>) attributes {dimension_semantics = [#tpu.dimension_semantics<parallel>], iteration_bounds = array<i64: 1>, scalar_prefetch = 0 : i64, scratch_operands = 0 : i64, tpu.core_type = #tpu.core_type<tc>, window_params = [{transform_indices = @transform_0, window_bounds = array<i64: 512, 384>}, {pipeline_mode = #tpu.pipeline_mode<synchronous>, transform_indices = @transform_1, window_bounds = array<i64: 384, 128>}, {pipeline_mode = #tpu.pipeline_mode<synchronous>, transform_indices = @transform_2, window_bounds = array<i64: 1, 128>}, {transform_indices = @transform_3, window_bounds = array<i64: 512, 128>}]} {
    %c0 = arith.constant 0 : index
    %c0_0 = arith.constant 0 : index
    %0 = vector.load %arg1[%c0, %c0_0] : memref<512x384xbf16, #tpu.memory_space<vmem>>, vector<512x384xbf16>
    %c0_1 = arith.constant 0 : index
    %c0_2 = arith.constant 0 : index
    %1 = vector.load %arg2[%c0_1, %c0_2] : memref<384x128xbf16, #tpu.memory_space<vmem>>, vector<384x128xbf16>
    %cst = arith.constant dense<0.000000e+00> : vector<512x128xf32>
    %2 = tpu.matmul %0, %1, %cst {dimension_numbers = #tpu.dot_dimension_numbers<[1], [0], [0], [1], [0, 0, 1, 1], [], []>} : vector<512x384xbf16>, vector<384x128xbf16>, vector<512x128xf32> -> vector<512x128xf32>
    %c0_3 = arith.constant 0 : index
    %c0_4 = arith.constant 0 : index
    %3 = vector.load %arg3[%c0_3, %c0_4] : memref<1x128xf32, #tpu.memory_space<vmem>>, vector<1x128xf32>
    %4 = vector.broadcast %3 : vector<1x128xf32> to vector<512x128xf32>
    %5 = arith.addf %2, %4 : vector<512x128xf32>
    %6 = math.tanh %5 : vector<512x128xf32>
    %7 = arith.truncf %6 : vector<512x128xf32> to vector<512x128xbf16>
    %c0_5 = arith.constant 0 : index
    %c0_6 = arith.constant 0 : index
    %8 = vector.load %arg4[%c0_5, %c0_6] : memref<512x128xbf16, #tpu.memory_space<vmem>>, vector<512x128xbf16>
    tpu.vector_store %arg4[%c0_5, %c0_6], %7 {strides = array<i32>} : memref<512x128xbf16, #tpu.memory_space<vmem>>, vector<512x128xbf16>,
    return
  }
  func.func @transform_0(%arg0: i32) -> (i32, i32) {
    %c0_i32 = arith.constant 0 : i32
    %c0_i32_0 = arith.constant 0 : i32
    return %arg0, %c0_i32 : i32, i32
  }
  func.func @transform_1(%arg0: i32) -> (i32, i32) {
    %c0_i32 = arith.constant 0 : i32
    %c0_i32_0 = arith.constant 0 : i32
    %c0_i32_1 = arith.constant 0 : i32
    return %c0_i32, %c0_i32_0 : i32, i32
  }
  func.func @transform_2(%arg0: i32) -> (i32, i32) {
    %c0_i32 = arith.constant 0 : i32
    %c0_i32_0 = arith.constant 0 : i32
    %c0_i32_1 = arith.constant 0 : i32
    return %c0_i32, %c0_i32_0 : i32, i32
  }
  func.func @transform_3(%arg0: i32) -> (i32, i32) {
    %c0_i32 = arith.constant 0 : i32
    %c0_i32_0 = arith.constant 0 : i32
    return %arg0, %c0_i32 : i32, i32
  }
}

</mosaic_0001>

<bundles_post_ra>
// kernel: _lambda_.5
= control target key start
LH: loop header
LB: loop body
LE: loop exit
PB: predicated region body
PF: predicated region fallthrough
CT: control target
= control target key end

     0   :  { %s672_s1 = inlined_call_operand.vmem [shape: bf16[128,128], index: 1, kind: input, shape index: {}]   ;;  %s673_s0 = inlined_call_operand.vmem [shape: bf16[128,128], index: 0, kind: input, shape index: {}]   ;;  %s674_s2 = inlined_call_operand.vmem [shape: f32[1,128], index: 2, kind: input, shape index: {}]   ;;  %s675_s3 = inlined_call_operand.vmem [shape: bf16[128,128], index: 3, kind: output, shape index: {}]  }
   0x1   :  { %v539_v0 = vld [vmem:[%s672_s1] sm:$0xff]   ;;  %v540_v1 = vld [vmem:[%s672_s1 + $0x8] sm:$0xff]   ;;  %v541_v2 = vld [vmem:[%s672_s1 + $0x10] sm:$0xff]  }
   0x2   :  { %491 = vmatprep.subr.bf16.mxu0 %v539_v0  ;;  %523 = vmatprep.subr.bf16.mxu1 %v539_v0  ;;  %v542_v3 = vld [vmem:[%s672_s1 + $0x18] sm:$0xff]   ;;  %v547_v4 = vld [vmem:[%s673_s0] sm:$0xff]   ;;  %v544_v7 = vld [vmem:[%s672_s1 + $0x28] sm:$0xff]  }
   0x3   :  { %492 = vmatpush3.bf16.msra.mxu0 %v539_v0  ;;  %531 = vmatpush3.bf16.msra.mxu1 %v539_v0  ;;  %v548_v5 = vld [vmem:[%s673_s0 + $0x20] sm:$0xff]   ;;  %v545_v8 = vld [vmem:[%s672_s1 + $0x30] sm:$0xff]   ;;  %v546_v9 = vld [vmem:[%s672_s1 + $0x38] sm:$0xff]  }
   0x4   :  { %493 = vmatprep.subr.bf16.mxu0 %v540_v1  ;;  %524 = vmatprep.subr.bf16.mxu1 %v540_v1  ;;  %v543_v6 = vld [vmem:[%s672_s1 + $0x20] sm:$0xff]   ;;  %v549_v10 = vld [vmem:[%s673_s0 + $0x8] sm:$0xff]   ;;  %v551_v12 = vld [vmem:[%s673_s0 + $0x10] sm:$0xff]  }
   0x5   :  { %507 = vmatprep.mubr.bf16.mxu0 %v547_v4  ;;  %515 = vmatprep.mubr.bf16.mxu1 %v548_v5  ;;  %v550_v11 = vld [vmem:[%s673_s0 + $0x28] sm:$0xff]   ;;  %v552_v13 = vld [vmem:[%s673_s0 + $0x30] sm:$0xff]   ;;  %v553_v14 = vld [vmem:[%s673_s0 + $0x18] sm:$0xff]  }
   0x6   :  { %v554_v15 = vld [vmem:[%s673_s0 + $0x38] sm:$0xff]   ;;  %v626_v16 = vld [vmem:[%s674_s2] ss:$0 sm:$0xff] }
   0x7   :  { %494 = vmatpush3.bf16.msra.mxu0 %v540_v1  ;;  %532 = vmatpush3.bf16.msra.mxu1 %v540_v1 }
   0x8   :  { %495 = vmatprep.subr.bf16.mxu0 %v541_v2  ;;  %525 = vmatprep.subr.bf16.mxu1 %v541_v2 }
   0xb   :  { %496 = vmatpush3.bf16.msra.mxu0 %v541_v2  ;;  %533 = vmatpush3.bf16.msra.mxu1 %v541_v2 }
   0xc   :  { %497 = vmatprep.subr.bf16.mxu0 %v542_v3  ;;  %526 = vmatprep.subr.bf16.mxu1 %v542_v3 }
   0xf   :  { %498 = vmatpush3.bf16.msra.mxu0 %v542_v3  ;;  %534 = vmatpush3.bf16.msra.mxu1 %v542_v3 }
  0x10   :  { %499 = vmatprep.subr.bf16.mxu0 %v543_v6  ;;  %527 = vmatprep.subr.bf16.mxu1 %v543_v6 }
  0x13   :  { %500 = vmatpush3.bf16.msra.mxu0 %v543_v6  ;;  %535 = vmatpush3.bf16.msra.mxu1 %v543_v6 }
  0x14   :  { %501 = vmatprep.subr.bf16.mxu0 %v544_v7  ;;  %528 = vmatprep.subr.bf16.mxu1 %v544_v7 }
  0x17   :  { %502 = vmatpush3.bf16.msra.mxu0 %v544_v7  ;;  %536 = vmatpush3.bf16.msra.mxu1 %v544_v7 }
  0x18   :  { %503 = vmatprep.subr.bf16.mxu0 %v545_v8  ;;  %529 = vmatprep.subr.bf16.mxu1 %v545_v8 }
  0x1b   :  { %504 = vmatpush3.bf16.msra.mxu0 %v545_v8  ;;  %537 = vmatpush3.bf16.msra.mxu1 %v545_v8 }
  0x1c   :  { %505 = vmatprep.subr.bf16.mxu0 %v546_v9  ;;  %530 = vmatprep.subr.bf16.mxu1 %v546_v9 }
  0x1f   :  { %506 = vmatpush3.bf16.msra.mxu0 %v546_v9  ;;  %538 = vmatpush3.bf16.msra.mxu1 %v546_v9 }
  0x22   :  { %508 = vmatmul.mubr.bf16.vlgmr.msra.gmra.mrb[0].mxu0 %v549_v10  ;;  %516 = vmatmul.mubr.bf16.vlgmr.msra.gmra.mrb[0].mxu1 %v550_v11 }
  0x23   :  { %511 = vmatprep.mubr.bf16.mxu0 %v551_v12  ;;  %519 = vmatprep.mubr.bf16.mxu1 %v552_v13 }
  0x2a   :  { %512 = vmatmul.mubr.bf16.gmra.mrb[4].mxu0 %v553_v14  ;;  %520 = vmatmul.mubr.bf16.gmra.mrb[4].mxu1 %v554_v15 }
  0xf5   :  { %v509_v17 = vpop.f32.mrb[0].mxu0  ;;  %v517_v18 = vpop.f32.mrb[0].mxu1 }
  0xf6   :  { %v193_v19 = vadd.f32 %v509_v17, %v626_v16  ;;  %v225_v20 = vadd.f32 %v517_v18, %v626_v16  ;;  %v184_v21 = vpop.f32.mrb[1].mxu0  ;;  %v216_v22 = vpop.f32.mrb[1].mxu1 }
  0xf7   :  { %v185_v23 = vadd.f32 %v626_v16, %v184_v21  ;;  %v217_v24 = vadd.f32 %v626_v16, %v216_v22  ;;  %v510_v25 = vpop.f32.mrb[2].mxu0  ;;  %v518_v26 = vpop.f32.mrb[2].mxu1 }
  0xf8   :  { %vm249_vm0 = vcmp.gt.f32.partialorder %v193_v19, 0.0  ;;  %v265_v27 = vmul.f32 0.2, %v193_v19  ;;  %vm257_vm1 = vcmp.gt.f32.partialorder %v225_v20, 0.0  ;;  %v273_v28 = vmul.f32 0.2, %v225_v20 }
  0xf9   :  { %vm247_vm2 = vcmp.gt.f32.partialorder %v185_v23, 0.0  ;;  %v263_v29 = vmul.f32 0.2, %v185_v23  ;;  %vm255_vm3 = vcmp.gt.f32.partialorder %v217_v24, 0.0  ;;  %v271_v30 = vmul.f32 0.2, %v217_v24 }
  0xfa   :  { %v196_v31 = vadd.f32 %v510_v25, %v626_v16  ;;  %v228_v32 = vadd.f32 %v518_v26, %v626_v16  ;;  %v187_v33 = vpop.f32.mrb[3].mxu0  ;;  %v219_v34 = vpop.f32.mrb[3].mxu1  ;;  %v281_v35 = vsel %vm249_vm0, %v193_v19, %v265_v27  ;;  %v289_v36 = vsel %vm257_vm1, %v225_v20, %v273_v28 }
  0xfb   :  { %v188_v37 = vadd.f32 %v626_v16, %v187_v33  ;;  %v220_v38 = vadd.f32 %v626_v16, %v219_v34  ;;  %v279_v43 = vsel %vm247_vm2, %v185_v23, %v263_v29  ;;  %v287_v44 = vsel %vm255_vm3, %v217_v24, %v271_v30 }
  0xfc   :  { %vm250_vm4 = vcmp.gt.f32.partialorder %v196_v31, 0.0  ;;  %v266_v39 = vmul.f32 0.2, %v196_v31  ;;  %vm258_vm5 = vcmp.gt.f32.partialorder %v228_v32, 0.0  ;;  %v274_v40 = vmul.f32 0.2, %v228_v32 }
  0xfd   :  { %vm248_vm6 = vcmp.gt.f32.partialorder %v188_v37, 0.0  ;;  %v264_v41 = vmul.f32 0.2, %v188_v37  ;;  %vm256_vm7 = vcmp.gt.f32.partialorder %v220_v38, 0.0  ;;  %v272_v42 = vmul.f32 0.2, %v220_v38 }
  0xfe   :  { %v282_v45 = vsel %vm250_vm4, %v196_v31, %v266_v39  ;;  %v290_v46 = vsel %vm258_vm5, %v228_v32, %v274_v40  ;;  %v513_v47 = vpop.f32.mrb[4].mxu0  ;;  %v521_v48 = vpop.f32.mrb[4].mxu1 }
  0xff   :  { %v436_v49 = vpack.c.bf16 %v282_v45, %v281_v35  ;;  %v456_v50 = vpack.c.bf16 %v290_v46, %v289_v36  ;;  %v280_v51 = vsel %vm248_vm6, %v188_v37, %v264_v41  ;;  %v288_v52 = vsel %vm256_vm7, %v220_v38, %v272_v42  ;;  %v200_v53 = vpop.f32.mrb[5].mxu0  ;;  %v232_v54 = vpop.f32.mrb[5].mxu1 }
 0x100   :  { %v431_v55 = vpack.c.bf16 %v280_v51, %v279_v43  ;;  %v451_v56 = vpack.c.bf16 %v288_v52, %v287_v44  ;;  %v209_v57 = vadd.f32 %v513_v47, %v626_v16  ;;  %v241_v58 = vadd.f32 %v521_v48, %v626_v16  ;;  %v514_v59 = vpop.f32.mrb[6].mxu0  ;;  %v522_v60 = vpop.f32.mrb[6].mxu1 }
 0x101   :  { %468 = vst [vmem:[%s675_s3 + $0x8] sm:$0xff] %v436_v49   ;;  %472 = vst [vmem:[%s675_s3 + $0x28] sm:$0xff] %v456_v50   ;;  %v201_v61 = vadd.f32 %v626_v16, %v200_v53  ;;  %v233_v62 = vadd.f32 %v626_v16, %v232_v54  ;;  %v212_v63 = vadd.f32 %v514_v59, %v626_v16  ;;  %v203_v1 = vpop.f32.mrb[7].mxu0  ;;  %v235_v2 = vpop.f32.mrb[7].mxu1 }
 0x102   :  { %v244_v0 = vadd.f32 %v522_v60, %v626_v16  ;;  %432 = vst [vmem:[%s675_s3] sm:$0xff] %v431_v55   ;;  %471 = vst [vmem:[%s675_s3 + $0x20] sm:$0xff] %v451_v56   ;;  %v269_v3 = vmul.f32 0.2, %v209_v57  ;;  %vm253_vm8 = vcmp.gt.f32.partialorder %v209_v57, 0.0  ;;  %v277_v4 = vmul.f32 0.2, %v241_v58 }
 0x103   :  { %vm261_vm9 = vcmp.gt.f32.partialorder %v241_v58, 0.0  ;;  %vm251_vm10 = vcmp.gt.f32.partialorder %v201_v61, 0.0  ;;  %vm254_vm11 = vcmp.gt.f32.partialorder %v212_v63, 0.0  ;;  %v270_v5 = vmul.f32 0.2, %v212_v63 }
 0x104   :  { %v267_v6 = vmul.f32 0.2, %v201_v61  ;;  %vm259_vm12 = vcmp.gt.f32.partialorder %v233_v62, 0.0  ;;  %vm262_vm13 = vcmp.gt.f32.partialorder %v244_v0, 0.0  ;;  %v278_v7 = vmul.f32 0.2, %v244_v0 }
 0x105   :  { %v285_v8 = vsel %vm253_vm8, %v209_v57, %v269_v3  ;;  %v286_v9 = vsel %vm254_vm11, %v212_v63, %v270_v5  ;;  %v204_v10 = vadd.f32 %v626_v16, %v203_v1  ;;  %v236_v11 = vadd.f32 %v626_v16, %v235_v2 }
 0x106   :  { %v293_v12 = vsel %vm261_vm9, %v241_v58, %v277_v4  ;;  %v275_v13 = vmul.f32 0.2, %v233_v62  ;;  %v446_v14 = vpack.c.bf16 %v286_v9, %v285_v8  ;;  %v294_v15 = vsel %vm262_vm13, %v244_v0, %v278_v7 }
 0x107   :  { %v466_v17 = vpack.c.bf16 %v294_v15, %v293_v12  ;;  %vm252_vm14 = vcmp.gt.f32.partialorder %v204_v10, 0.0  ;;  %v268_v18 = vmul.f32 0.2, %v204_v10  ;;  %vm260_vm15 = vcmp.gt.f32.partialorder %v236_v11, 0.0 }
 0x108   :  { %470 = vst [vmem:[%s675_s3 + $0x18] sm:$0xff] %v446_v14   ;;  %v276_v19 = vmul.f32 0.2, %v236_v11  ;;  %v283_v20 = vsel %vm251_vm10, %v201_v61, %v267_v6  ;;  %v291_v21 = vsel %vm259_vm12, %v233_v62, %v275_v13 }
 0x109   :  { %474 = vst [vmem:[%s675_s3 + $0x38] sm:$0xff] %v466_v17   ;;  %v284_v16 = vsel %vm252_vm14, %v204_v10, %v268_v18 }
 0x10a   :  { %v441_v22 = vpack.c.bf16 %v284_v16, %v283_v20  ;;  %v292_v23 = vsel %vm260_vm15, %v236_v11, %v276_v19 }
 0x10b   :  { %v461_v24 = vpack.c.bf16 %v292_v23, %v291_v21 }
 0x10c   :  { %469 = vst [vmem:[%s675_s3 + $0x10] sm:$0xff] %v441_v22  }
 0x10d   :  { %473 = vst [vmem:[%s675_s3 + $0x30] sm:$0xff] %v461_v24  }

// kernel: _lambda_.6
= control target key start
LH: loop header
LB: loop body
LE: loop exit
PB: predicated region body
PF: predicated region fallthrough
CT: control target
= control target key end

     0   :  { %s769_s1 = inlined_call_operand.vmem [shape: bf16[512,128], index: 1, kind: input, shape index: {}]   ;;  %s770_s0 = inlined_call_operand.vmem [shape: bf16[32,512], index: 0, kind: input, shape index: {}]   ;;  %s771_s2 = inlined_call_operand.vmem [shape: f32[1,128], index: 2, kind: input, shape index: {}]   ;;  %s772_s3 = inlined_call_operand.vmem [shape: bf16[32,128], index: 3, kind: output, shape index: {}]  }
   0x1   :  { %v576_v0 = vld [vmem:[%s769_s1 + $0x40] sm:$0xff]   ;;  %v580_v4 = vld [vmem:[%s769_s1 + $0x48] sm:$0xff]   ;;  %v584_v8 = vld [vmem:[%s769_s1 + $0x50] sm:$0xff]  }
   0x2   :  { %v577_v1 = vld [vmem:[%s769_s1 + $0xc0] sm:$0xff]   ;;  %520 = vmatprep.subr.bf16.mxu0 %v576_v0  ;;  %v581_v5 = vld [vmem:[%s769_s1 + $0xc8] sm:$0xff]   ;;  %v585_v9 = vld [vmem:[%s769_s1 + $0xd0] sm:$0xff]  }
   0x3   :  { %v578_v2 = vld [vmem:[%s769_s1] sm:$0xff]   ;;  %548 = vmatprep.subr.bf16.mxu1 %v577_v1  ;;  %v582_v6 = vld [vmem:[%s769_s1 + $0x8] sm:$0xff]   ;;  %v586_v10 = vld [vmem:[%s769_s1 + $0x10] sm:$0xff]  }
   0x4   :  { %v579_v3 = vld [vmem:[%s769_s1 + $0x80] sm:$0xff]   ;;  %521 = vmatpush3.bf16.msra.mxu0 %v578_v2  ;;  %v583_v7 = vld [vmem:[%s769_s1 + $0x88] sm:$0xff]   ;;  %v587_v11 = vld [vmem:[%s769_s1 + $0x90] sm:$0xff]  }
   0x5   :  { %549 = vmatpush3.bf16.msra.mxu1 %v579_v3  ;;  %522 = vmatprep.subr.bf16.mxu0 %v580_v4  ;;  %v588_v12 = vld [vmem:[%s769_s1 + $0x58] sm:$0xff]   ;;  %v592_v16 = vld [vmem:[%s769_s1 + $0x60] sm:$0xff]   ;;  %v596_v20 = vld [vmem:[%s769_s1 + $0x68] sm:$0xff]  }
   0x6   :  { %550 = vmatprep.subr.bf16.mxu1 %v581_v5  ;;  %v589_v13 = vld [vmem:[%s769_s1 + $0xd8] sm:$0xff]   ;;  %v593_v17 = vld [vmem:[%s769_s1 + $0xe0] sm:$0xff]   ;;  %v597_v21 = vld [vmem:[%s769_s1 + $0xe8] sm:$0xff]  }
   0x7   :  { %v590_v14 = vld [vmem:[%s769_s1 + $0x18] sm:$0xff]   ;;  %v594_v18 = vld [vmem:[%s769_s1 + $0x20] sm:$0xff]   ;;  %v598_v22 = vld [vmem:[%s769_s1 + $0x28] sm:$0xff]  }
   0x8   :  { %523 = vmatpush3.bf16.msra.mxu0 %v582_v6  ;;  %v591_v15 = vld [vmem:[%s769_s1 + $0x98] sm:$0xff]   ;;  %v595_v19 = vld [vmem:[%s769_s1 + $0xa0] sm:$0xff]   ;;  %v599_v23 = vld [vmem:[%s769_s1 + $0xa8] sm:$0xff]  }
   0x9   :  { %551 = vmatpush3.bf16.msra.mxu1 %v583_v7  ;;  %524 = vmatprep.subr.bf16.mxu0 %v584_v8  ;;  %v600_v24 = vld [vmem:[%s769_s1 + $0x70] sm:$0xff]   ;;  %v604_v28 = vld [vmem:[%s769_s1 + $0x78] sm:$0xff]   ;;  %v460_v42 = vld [vmem:[%s771_s2] ss:$0 sm:$0xff] }
   0xa   :  { %552 = vmatprep.subr.bf16.mxu1 %v585_v9  ;;  %v601_v25 = vld [vmem:[%s769_s1 + $0xf0] sm:$0xff]   ;;  %v605_v29 = vld [vmem:[%s769_s1 + $0xf8] sm:$0xff]  }
   0xb   :  { %v602_v26 = vld [vmem:[%s769_s1 + $0x30] sm:$0xff]   ;;  %v606_v30 = vld [vmem:[%s769_s1 + $0x38] sm:$0xff]  }
   0xc   :  { %525 = vmatpush3.bf16.msra.mxu0 %v586_v10  ;;  %v603_v27 = vld [vmem:[%s769_s1 + $0xb0] sm:$0xff]   ;;  %v607_v31 = vld [vmem:[%s769_s1 + $0xb8] sm:$0xff]  }
   0xd   :  { %553 = vmatpush3.bf16.msra.mxu1 %v587_v11  ;;  %526 = vmatprep.subr.bf16.mxu0 %v588_v12  ;;  %v608_v32 = vld [vmem:[%s770_s0] ss:$16 sps:$4 sm:$0xff]   ;;  %v610_v33 = vld [vmem:[%s770_s0 + $0x4] ss:$16 sps:$4 sm:$0xff]   ;;  %v611_v34 = vld [vmem:[%s770_s0 + $0x8] ss:$16 sps:$4 sm:$0xff]  }
   0xe   :  { %554 = vmatprep.subr.bf16.mxu1 %v589_v13  ;;  %v613_v35 = vld [vmem:[%s770_s0 + $0xc] ss:$16 sps:$4 sm:$0xff]   ;;  %358 = vmatprep.mubr.bf16.mxu0 %v610_v33  ;;  %v614_v36 = vld [vmem:[%s770_s0 + $0x24] ss:$16 sps:$4 sm:$0xff]   ;;  %v618_v38 = vld [vmem:[%s770_s0 + $0x20] ss:$16 sps:$4 sm:$0xff]  }
   0xf   :  { %407 = vmatprep.mubr.bf16.mxu1 %v613_v35  ;;  %v616_v37 = vld [vmem:[%s770_s0 + $0x2c] ss:$16 sps:$4 sm:$0xff]   ;;  %v619_v39 = vld [vmem:[%s770_s0 + $0x28] ss:$16 sps:$4 sm:$0xff]  }
  0x10   :  { %527 = vmatpush3.bf16.msra.mxu0 %v590_v14 }
  0x11   :  { %555 = vmatpush3.bf16.msra.mxu1 %v591_v15  ;;  %528 = vmatprep.subr.bf16.mxu0 %v592_v16 }
  0x12   :  { %556 = vmatprep.subr.bf16.mxu1 %v593_v17 }
  0x14   :  { %529 = vmatpush3.bf16.msra.mxu0 %v594_v18 }
  0x15   :  { %557 = vmatpush3.bf16.msra.mxu1 %v595_v19  ;;  %530 = vmatprep.subr.bf16.mxu0 %v596_v20 }
  0x16   :  { %558 = vmatprep.subr.bf16.mxu1 %v597_v21 }
  0x18   :  { %531 = vmatpush3.bf16.msra.mxu0 %v598_v22 }
  0x19   :  { %559 = vmatpush3.bf16.msra.mxu1 %v599_v23  ;;  %532 = vmatprep.subr.bf16.mxu0 %v600_v24 }
  0x1a   :  { %560 = vmatprep.subr.bf16.mxu1 %v601_v25 }
  0x1c   :  { %533 = vmatpush3.bf16.msra.mxu0 %v602_v26 }
  0x1d   :  { %561 = vmatpush3.bf16.msra.mxu1 %v603_v27  ;;  %534 = vmatprep.subr.bf16.mxu0 %v604_v28 }
  0x1e   :  { %562 = vmatprep.subr.bf16.mxu1 %v605_v29 }
  0x20   :  { %535 = vmatpush3.bf16.msra.mxu0 %v606_v30 }
  0x21   :  { %563 = vmatpush3.bf16.msra.mxu1 %v607_v31 }
  0x23   :  { %359 = vmatmul.mubr.bf16.vlgmr.msra.gmra.mrb[0].mxu0 %v608_v32 }
  0x24   :  { %408 = vmatmul.mubr.bf16.vlgmr.msra.gmra.mrb[0].mxu1 %v611_v34  ;;  %366 = vmatprep.mubr.bf16.mxu0 %v614_v36 }
  0x25   :  { %415 = vmatprep.mubr.bf16.mxu1 %v616_v37 }
  0x2b   :  { %367 = vmatmul.mubr.bf16.gmra.mrb[4].mxu0 %v618_v38 }
  0x2c   :  { %416 = vmatmul.mubr.bf16.gmra.mrb[4].mxu1 %v619_v39 }
  0xf6   :  { %v536_v40 = vpop.f32.mrb[0].mxu0 }
  0xf7   :  { %v564_v41 = vpop.f32.mrb[0].mxu1  ;;  %v537_v43 = vpop.f32.mrb[1].mxu0 }
  0xf8   :  { %v538_v44 = vadd.f32 %v537_v43, %v536_v40  ;;  %v565_v45 = vpop.f32.mrb[1].mxu1  ;;  %v539_v46 = vpop.f32.mrb[2].mxu0 }
  0xf9   :  { %v566_v47 = vadd.f32 %v565_v45, %v564_v41  ;;  %v567_v48 = vpop.f32.mrb[2].mxu1  ;;  %v540_v49 = vpop.f32.mrb[3].mxu0 }
  0xfa   :  { %v361_v50 = vadd.f32 %v538_v44, %v460_v42  ;;  %v541_v51 = vadd.f32 %v540_v49, %v539_v46  ;;  %v568_v52 = vpop.f32.mrb[3].mxu1 }
  0xfb   :  { %v569_v53 = vadd.f32 %v568_v52, %v567_v48 }
  0xfc   :  { %v410_v54 = vadd.f32 %v566_v47, %v361_v50  ;;  %v364_v55 = vadd.f32 %v541_v51, %v460_v42 }
  0xfe   :  { %v428_v56 = vmul.f32 0.2, %v410_v54  ;;  %v413_v57 = vadd.f32 %v569_v53, %v364_v55  ;;  %v542_v58 = vpop.f32.mrb[4].mxu0  ;;  %vm424_vm0 = vcmp.gt.f32.partialorder %v410_v54, 0.0 }
  0xff   :  { %v570_v59 = vpop.f32.mrb[4].mxu1  ;;  %v543_v60 = vpop.f32.mrb[5].mxu0 }
 0x100   :  { %vm425_vm1 = vcmp.gt.f32.partialorder %v413_v57, 0.0  ;;  %v429_v61 = vmul.f32 0.2, %v413_v57  ;;  %v544_v62 = vadd.f32 %v543_v60, %v542_v58  ;;  %v571_v63 = vpop.f32.mrb[5].mxu1  ;;  %v545_v0 = vpop.f32.mrb[6].mxu0  ;;  %v432_v4 = vsel %vm424_vm0, %v410_v54, %v428_v56 }
 0x101   :  { %v572_v1 = vadd.f32 %v571_v63, %v570_v59  ;;  %v573_v2 = vpop.f32.mrb[6].mxu1  ;;  %v546_v3 = vpop.f32.mrb[7].mxu0 }
 0x102   :  { %v433_v5 = vsel %vm425_vm1, %v413_v57, %v429_v61  ;;  %v369_v6 = vadd.f32 %v544_v62, %v460_v42  ;;  %v547_v7 = vadd.f32 %v546_v3, %v545_v0  ;;  %v574_v8 = vpop.f32.mrb[7].mxu1 }
 0x103   :  { %v512_v9 = vpack.c.bf16 %v433_v5, %v432_v4  ;;  %v575_v10 = vadd.f32 %v574_v8, %v573_v2 }
 0x104   :  { %v418_v11 = vadd.f32 %v572_v1, %v369_v6  ;;  %v372_v12 = vadd.f32 %v547_v7, %v460_v42 }
 0x105   :  { %513 = vst [vmem:[%s772_s3] sm:$0xff] %v512_v9  }
 0x106   :  { %v430_v13 = vmul.f32 0.2, %v418_v11  ;;  %v421_v14 = vadd.f32 %v575_v10, %v372_v12  ;;  %vm426_vm2 = vcmp.gt.f32.partialorder %v418_v11, 0.0 }
 0x108   :  { %vm427_vm3 = vcmp.gt.f32.partialorder %v421_v14, 0.0  ;;  %v431_v15 = vmul.f32 0.2, %v421_v14  ;;  %v434_v16 = vsel %vm426_vm2, %v418_v11, %v430_v13 }
 0x10a   :  { %v435_v17 = vsel %vm427_vm3, %v421_v14, %v431_v15 }
 0x10b   :  { %v517_v18 = vpack.c.bf16 %v435_v17, %v434_v16 }
 0x10d   :  { %519 = vst [vmem:[%s772_s3 + $0x8] sm:$0xff] %v517_v18  }

// kernel: _lambda_.7
= control target key start
LH: loop header
LB: loop body
LE: loop exit
PB: predicated region body
PF: predicated region fallthrough
CT: control target
= control target key end

     0   :  { %s639_s1 = inlined_call_operand.vmem [shape: bf16[384,128], index: 1, kind: input, shape index: {}]   ;;  %s640_s0 = inlined_call_operand.vmem [shape: bf16[32,384], index: 0, kind: input, shape index: {}]   ;;  %s641_s2 = inlined_call_operand.vmem [shape: f32[1,128], index: 2, kind: input, shape index: {}]   ;;  %s642_s3 = inlined_call_operand.vmem [shape: bf16[32,128], index: 3, kind: output, shape index: {}]  }
   0x1   :  { %v488_v0 = vld [vmem:[%s639_s1 + $0x40] sm:$0xff]   ;;  %v490_v2 = vld [vmem:[%s639_s1 + $0x48] sm:$0xff]   ;;  %v493_v5 = vld [vmem:[%s639_s1 + $0x50] sm:$0xff]  }
   0x2   :  { %v489_v1 = vld [vmem:[%s639_s1] sm:$0xff]   ;;  %430 = vmatprep.subr.bf16.mxu0 %v488_v0  ;;  %v492_v4 = vld [vmem:[%s639_s1 + $0x8] sm:$0xff]   ;;  %v495_v7 = vld [vmem:[%s639_s1 + $0x10] sm:$0xff]  }
   0x3   :  { %431 = vmatpush3.bf16.msra.mxu0 %v489_v1  ;;  %v491_v3 = vld [vmem:[%s639_s1 + $0x80] sm:$0xff]   ;;  %v494_v6 = vld [vmem:[%s639_s1 + $0x88] sm:$0xff]   ;;  %v496_v8 = vld [vmem:[%s639_s1 + $0x58] sm:$0xff]  }
   0x4   :  { %432 = vmatprep.subr.bf16.mxu0 %v490_v2  ;;  %468 = vmatprep.subr.bf16.mxu1 %v491_v3  ;;  %v497_v9 = vld [vmem:[%s639_s1 + $0x90] sm:$0xff]   ;;  %v498_v10 = vld [vmem:[%s639_s1 + $0x18] sm:$0xff]   ;;  %v499_v11 = vld [vmem:[%s639_s1 + $0x60] sm:$0xff]  }
   0x5   :  { %469 = vmatpush3.bf16.msra.mxu1 %v491_v3  ;;  %v500_v12 = vld [vmem:[%s639_s1 + $0x98] sm:$0xff]   ;;  %v501_v13 = vld [vmem:[%s639_s1 + $0x20] sm:$0xff]   ;;  %v502_v15 = vld [vmem:[%s639_s1 + $0x68] sm:$0xff]  }
   0x6   :  { %470 = vmatprep.subr.bf16.mxu1 %v494_v6  ;;  %v503_v14 = vld [vmem:[%s639_s1 + $0xa0] sm:$0xff]   ;;  %v504_v16 = vld [vmem:[%s639_s1 + $0x28] sm:$0xff]   ;;  %v505_v18 = vld [vmem:[%s639_s1 + $0x70] sm:$0xff]  }
   0x7   :  { %433 = vmatpush3.bf16.msra.mxu0 %v492_v4  ;;  %v506_v17 = vld [vmem:[%s639_s1 + $0xa8] sm:$0xff]   ;;  %v507_v19 = vld [vmem:[%s639_s1 + $0x30] sm:$0xff]   ;;  %v508_v20 = vld [vmem:[%s639_s1 + $0x78] sm:$0xff]  }
   0x8   :  { %434 = vmatprep.subr.bf16.mxu0 %v493_v5  ;;  %v509_v21 = vld [vmem:[%s639_s1 + $0xb0] sm:$0xff]   ;;  %v510_v23 = vld [vmem:[%s639_s1 + $0x38] sm:$0xff]   ;;  %v511_v26 = vld [vmem:[%s640_s0] ss:$12 sps:$4 sm:$0xff]  }
   0x9   :  { %471 = vmatpush3.bf16.msra.mxu1 %v494_v6  ;;  %v513_v22 = vld [vmem:[%s640_s0 + $0x4] ss:$12 sps:$4 sm:$0xff]   ;;  %v515_v24 = vld [vmem:[%s640_s0 + $0x8] ss:$12 sps:$4 sm:$0xff]   ;;  %v514_v25 = vld [vmem:[%s639_s1 + $0xb8] sm:$0xff]  }
   0xa   :  { %472 = vmatprep.subr.bf16.mxu1 %v497_v9  ;;  %286 = vmatprep.mubr.bf16.mxu0 %v513_v22  ;;  %v517_v27 = vld [vmem:[%s640_s0 + $0x1c] ss:$12 sps:$4 sm:$0xff]   ;;  %v516_v28 = vld [vmem:[%s640_s0 + $0x20] ss:$12 sps:$4 sm:$0xff]   ;;  %v519_v29 = vld [vmem:[%s640_s0 + $0x18] ss:$12 sps:$4 sm:$0xff]  }
   0xb   :  { %435 = vmatpush3.bf16.msra.mxu0 %v495_v7  ;;  %484 = vmatprep.mubr.bf16.mxu1 %v515_v24  ;;  %v380_v32 = vld [vmem:[%s641_s2] ss:$0 sm:$0xff] }
   0xc   :  { %436 = vmatprep.subr.bf16.mxu0 %v496_v8 }
   0xd   :  { %473 = vmatpush3.bf16.msra.mxu1 %v497_v9 }
   0xe   :  { %474 = vmatprep.subr.bf16.mxu1 %v500_v12 }
   0xf   :  { %437 = vmatpush3.bf16.msra.mxu0 %v498_v10 }
  0x10   :  { %438 = vmatprep.subr.bf16.mxu0 %v499_v11 }
  0x11   :  { %475 = vmatpush3.bf16.msra.mxu1 %v500_v12 }
  0x12   :  { %476 = vmatprep.subr.bf16.mxu1 %v503_v14 }
  0x13   :  { %439 = vmatpush3.bf16.msra.mxu0 %v501_v13 }
  0x14   :  { %440 = vmatprep.subr.bf16.mxu0 %v502_v15 }
  0x15   :  { %477 = vmatpush3.bf16.msra.mxu1 %v503_v14 }
  0x16   :  { %478 = vmatprep.subr.bf16.mxu1 %v506_v17 }
  0x17   :  { %441 = vmatpush3.bf16.msra.mxu0 %v504_v16 }
  0x18   :  { %442 = vmatprep.subr.bf16.mxu0 %v505_v18 }
  0x19   :  { %479 = vmatpush3.bf16.msra.mxu1 %v506_v17 }
  0x1a   :  { %480 = vmatprep.subr.bf16.mxu1 %v509_v21 }
  0x1b   :  { %443 = vmatpush3.bf16.msra.mxu0 %v507_v19 }
  0x1c   :  { %444 = vmatprep.subr.bf16.mxu0 %v508_v20 }
  0x1d   :  { %481 = vmatpush3.bf16.msra.mxu1 %v509_v21 }
  0x1e   :  { %482 = vmatprep.subr.bf16.mxu1 %v514_v25 }
  0x1f   :  { %445 = vmatpush3.bf16.msra.mxu0 %v510_v23 }
  0x21   :  { %483 = vmatpush3.bf16.msra.mxu1 %v514_v25 }
  0x22   :  { %287 = vmatmul.mubr.bf16.vlgmr.msra.gmra.mrb[0].mxu0 %v511_v26 }
  0x23   :  { %294 = vmatprep.mubr.bf16.mxu0 %v517_v27 }
  0x24   :  { %485 = vmatmul.mubr.bf16.vlgmr.msra.gmra.mrb[0].mxu1 %v516_v28 }
  0x2a   :  { %295 = vmatmul.mubr.bf16.gmra.mrb[4].mxu0 %v519_v29 }
  0xf5   :  { %v446_v30 = vpop.f32.mrb[0].mxu0 }
  0xf6   :  { %v447_v31 = vpop.f32.mrb[1].mxu0 }
  0xf7   :  { %v448_v33 = vadd.f32 %v447_v31, %v446_v30  ;;  %v449_v34 = vpop.f32.mrb[2].mxu0  ;;  %v486_v36 = vpop.f32.mrb[0].mxu1 }
  0xf8   :  { %v450_v35 = vpop.f32.mrb[3].mxu0  ;;  %v337_v39 = vpop.f32.mrb[1].mxu1 }
  0xf9   :  { %v451_v37 = vadd.f32 %v450_v35, %v449_v34  ;;  %v289_v38 = vadd.f32 %v448_v33, %v380_v32  ;;  %v487_v40 = vpop.f32.mrb[2].mxu1 }
  0xfa   :  { %v340_v43 = vpop.f32.mrb[3].mxu1 }
  0xfb   :  { %v338_v41 = vadd.f32 %v337_v39, %v289_v38  ;;  %v292_v42 = vadd.f32 %v451_v37, %v380_v32 }
  0xfd   :  { %v341_v44 = vadd.f32 %v340_v43, %v292_v42  ;;  %v452_v45 = vpop.f32.mrb[4].mxu0  ;;  %v352_v47 = vmax.f32 %v338_v41, 0.0 }
  0xfe   :  { %v453_v46 = vpop.f32.mrb[5].mxu0 }
  0xff   :  { %v353_v48 = vmax.f32 %v341_v44, 0.0  ;;  %v454_v49 = vadd.f32 %v453_v46, %v452_v45  ;;  %v455_v50 = vpop.f32.mrb[6].mxu0 }
 0x100   :  { %v456_v51 = vpop.f32.mrb[7].mxu0 }
 0x101   :  { %v422_v52 = vpack.c.bf16 %v353_v48, %v352_v47  ;;  %v297_v53 = vadd.f32 %v454_v49, %v380_v32  ;;  %v457_v54 = vadd.f32 %v456_v51, %v455_v50 }
 0x103   :  { %423 = vst [vmem:[%s642_s3] sm:$0xff] %v422_v52   ;;  %v346_v55 = vadd.f32 %v486_v36, %v297_v53  ;;  %v300_v56 = vadd.f32 %v457_v54, %v380_v32 }
 0x105   :  { %v349_v57 = vadd.f32 %v487_v40, %v300_v56  ;;  %v354_v58 = vmax.f32 %v346_v55, 0.0 }
 0x107   :  { %v355_v59 = vmax.f32 %v349_v57, 0.0 }
 0x109   :  { %v427_v60 = vpack.c.bf16 %v355_v59, %v354_v58 }
 0x10b   :  { %429 = vst [vmem:[%s642_s3 + $0x8] sm:$0xff] %v427_v60  }

// kernel: _lambda_.8
= control target key start
LH: loop header
LB: loop body
LE: loop exit
PB: predicated region body
PF: predicated region fallthrough
CT: control target
= control target key end

     0   :  { %s1772_s1 = inlined_call_operand.vmem [shape: bf16[640,128], index: 1, kind: input, shape index: {}]   ;;  %s1773_s0 = inlined_call_operand.vmem [shape: bf16[128,640], index: 0, kind: input, shape index: {}]   ;;  %s1774_s2 = inlined_call_operand.vmem [shape: f32[1,128], index: 2, kind: input, shape index: {}]   ;;  %s1775_s3 = inlined_call_operand.vmem [shape: bf16[128,128], index: 3, kind: output, shape index: {}]  }
   0x1   :  { %v1341_v0 = vld [vmem:[%s1772_s1 + $0x40] sm:$0xff]   ;;  %v1345_v4 = vld [vmem:[%s1772_s1 + $0x48] sm:$0xff]   ;;  %v1349_v8 = vld [vmem:[%s1772_s1 + $0x50] sm:$0xff]  }
   0x2   :  { %v1342_v1 = vld [vmem:[%s1772_s1 + $0xc0] sm:$0xff]   ;;  %1149 = vmatprep.subr.bf16.mxu0 %v1341_v0  ;;  %v1346_v5 = vld [vmem:[%s1772_s1 + $0xc8] sm:$0xff]   ;;  %v1350_v9 = vld [vmem:[%s1772_s1 + $0xd0] sm:$0xff]  }
   0x3   :  { %v1343_v2 = vld [vmem:[%s1772_s1] sm:$0xff]   ;;  %1213 = vmatprep.subr.bf16.mxu1 %v1342_v1  ;;  %v1347_v6 = vld [vmem:[%s1772_s1 + $0x8] sm:$0xff]   ;;  %v1351_v10 = vld [vmem:[%s1772_s1 + $0x10] sm:$0xff]  }
   0x4   :  { %v1344_v3 = vld [vmem:[%s1772_s1 + $0x80] sm:$0xff]   ;;  %1150 = vmatpush3.bf16.msra.mxu0 %v1343_v2  ;;  %v1348_v7 = vld [vmem:[%s1772_s1 + $0x88] sm:$0xff]   ;;  %v1352_v11 = vld [vmem:[%s1772_s1 + $0x90] sm:$0xff]  }
   0x5   :  { %1214 = vmatpush3.bf16.msra.mxu1 %v1344_v3  ;;  %1151 = vmatprep.subr.bf16.mxu0 %v1345_v4  ;;  %v1353_v12 = vld [vmem:[%s1772_s1 + $0x58] sm:$0xff]   ;;  %v1357_v16 = vld [vmem:[%s1772_s1 + $0x60] sm:$0xff]   ;;  %v1361_v20 = vld [vmem:[%s1772_s1 + $0x68] sm:$0xff]  }
   0x6   :  { %1215 = vmatprep.subr.bf16.mxu1 %v1346_v5  ;;  %v1354_v13 = vld [vmem:[%s1772_s1 + $0xd8] sm:$0xff]   ;;  %v1358_v17 = vld [vmem:[%s1772_s1 + $0xe0] sm:$0xff]   ;;  %v1362_v21 = vld [vmem:[%s1772_s1 + $0xe8] sm:$0xff]  }
   0x7   :  { %v1355_v14 = vld [vmem:[%s1772_s1 + $0x18] sm:$0xff]   ;;  %v1359_v18 = vld [vmem:[%s1772_s1 + $0x20] sm:$0xff]   ;;  %v1363_v22 = vld [vmem:[%s1772_s1 + $0x28] sm:$0xff]  }
   0x8   :  { %1152 = vmatpush3.bf16.msra.mxu0 %v1347_v6  ;;  %v1356_v15 = vld [vmem:[%s1772_s1 + $0x98] sm:$0xff]   ;;  %v1360_v19 = vld [vmem:[%s1772_s1 + $0xa0] sm:$0xff]   ;;  %v1364_v23 = vld [vmem:[%s1772_s1 + $0xa8] sm:$0xff]  }
   0x9   :  { %1216 = vmatpush3.bf16.msra.mxu1 %v1348_v7  ;;  %1153 = vmatprep.subr.bf16.mxu0 %v1349_v8  ;;  %v1365_v24 = vld [vmem:[%s1772_s1 + $0x70] sm:$0xff]   ;;  %v1369_v28 = vld [vmem:[%s1772_s1 + $0x78] sm:$0xff]   ;;  %v1378_v35 = vld [vmem:[%s1773_s0 + $0xc] ss:$20 sps:$4 sm:$0xff]  }
   0xa   :  { %1217 = vmatprep.subr.bf16.mxu1 %v1350_v9  ;;  %v1366_v25 = vld [vmem:[%s1772_s1 + $0xf0] sm:$0xff]   ;;  %v1370_v29 = vld [vmem:[%s1772_s1 + $0xf8] sm:$0xff]   ;;  %v1379_v36 = vld [vmem:[%s1772_s1 + $0x100] sm:$0xff]   ;;  %727 = vmatprep.mubr.bf16.mxu1 %v1378_v35 }
   0xb   :  { %v1367_v26 = vld [vmem:[%s1772_s1 + $0x30] sm:$0xff]   ;;  %v1371_v30 = vld [vmem:[%s1772_s1 + $0x38] sm:$0xff]   ;;  %v1380_v37 = vld [vmem:[%s1773_s0 + $0x2c] ss:$20 sps:$4 sm:$0xff]  }
   0xc   :  { %1154 = vmatpush3.bf16.msra.mxu0 %v1351_v10  ;;  %v1368_v27 = vld [vmem:[%s1772_s1 + $0xb0] sm:$0xff]   ;;  %v1372_v31 = vld [vmem:[%s1772_s1 + $0xb8] sm:$0xff]   ;;  %v1386_v39 = vld [vmem:[%s1772_s1 + $0x108] sm:$0xff]  }
   0xd   :  { %1218 = vmatpush3.bf16.msra.mxu1 %v1352_v11  ;;  %1155 = vmatprep.subr.bf16.mxu0 %v1353_v12  ;;  %v1373_v32 = vld [vmem:[%s1773_s0] ss:$20 sps:$4 sm:$0xff]   ;;  %v1375_v33 = vld [vmem:[%s1773_s0 + $0x4] ss:$20 sps:$4 sm:$0xff]   ;;  %v1376_v34 = vld [vmem:[%s1773_s0 + $0x8] ss:$20 sps:$4 sm:$0xff]  }
   0xe   :  { %1219 = vmatprep.subr.bf16.mxu1 %v1354_v13  ;;  %630 = vmatprep.mubr.bf16.mxu0 %v1375_v33  ;;  %v1382_v38 = vld [vmem:[%s1773_s0 + $0x34] ss:$20 sps:$4 sm:$0xff]   ;;  %v1385_v41 = vld [vmem:[%s1773_s0 + $0x30] ss:$20 sps:$4 sm:$0xff]   ;;  %v1400_v45 = vld [vmem:[%s1772_s1 + $0x118] sm:$0xff]  }
   0xf   :  { %v1384_v40 = vld [vmem:[%s1773_s0 + $0x28] ss:$20 sps:$4 sm:$0xff]   ;;  %v1393_v44 = vld [vmem:[%s1772_s1 + $0x110] sm:$0xff]   ;;  %v1392_v47 = vld [vmem:[%s1773_s0 + $0x58] ss:$20 sps:$4 sm:$0xff]  }
  0x10   :  { %1156 = vmatpush3.bf16.msra.mxu0 %v1355_v14  ;;  %v1387_v42 = vld [vmem:[%s1773_s0 + $0x54] ss:$20 sps:$4 sm:$0xff]   ;;  %v1389_v43 = vld [vmem:[%s1773_s0 + $0x5c] ss:$20 sps:$4 sm:$0xff]   ;;  %v1396_v49 = vld [vmem:[%s1773_s0 + $0x84] ss:$20 sps:$4 sm:$0xff]  }
  0x11   :  { %1220 = vmatpush3.bf16.msra.mxu1 %v1356_v15  ;;  %1157 = vmatprep.subr.bf16.mxu0 %v1357_v16  ;;  %v1391_v46 = vld [vmem:[%s1773_s0 + $0x50] ss:$20 sps:$4 sm:$0xff]   ;;  %v1414_v51 = vld [vmem:[%s1772_s1 + $0x128] sm:$0xff]   ;;  %v1399_v53 = vld [vmem:[%s1773_s0 + $0x80] ss:$20 sps:$4 sm:$0xff]  }
  0x12   :  { %1221 = vmatprep.subr.bf16.mxu1 %v1358_v17  ;;  %v1394_v48 = vld [vmem:[%s1773_s0 + $0x7c] ss:$20 sps:$4 sm:$0xff]   ;;  %v1407_v50 = vld [vmem:[%s1772_s1 + $0x120] sm:$0xff]   ;;  %v1398_v52 = vld [vmem:[%s1773_s0 + $0x78] ss:$20 sps:$4 sm:$0xff]  }
  0x13   :  { %v1401_v54 = vld [vmem:[%s1773_s0 + $0xa4] ss:$20 sps:$4 sm:$0xff]   ;;  %v1421_v55 = vld [vmem:[%s1772_s1 + $0x130] sm:$0xff]   ;;  %v1403_v56 = vld [vmem:[%s1773_s0 + $0xac] ss:$20 sps:$4 sm:$0xff]  }
  0x14   :  { %1158 = vmatpush3.bf16.msra.mxu0 %v1359_v18  ;;  %v1428_v57 = vld [vmem:[%s1772_s1 + $0x138] sm:$0xff]   ;;  %v1405_v58 = vld [vmem:[%s1773_s0 + $0xa0] ss:$20 sps:$4 sm:$0xff]   ;;  %v1413_v63 = vld [vmem:[%s1773_s0 + $0xd0] ss:$20 sps:$4 sm:$0xff]  }
  0x15   :  { %1222 = vmatpush3.bf16.msra.mxu1 %v1360_v19  ;;  %1159 = vmatprep.subr.bf16.mxu0 %v1361_v20  ;;  %v1406_v59 = vld [vmem:[%s1773_s0 + $0xa8] ss:$20 sps:$4 sm:$0xff]   ;;  %v1408_v60 = vld [vmem:[%s1773_s0 + $0xcc] ss:$20 sps:$4 sm:$0xff]   ;;  %v1419_v2 = vld [vmem:[%s1773_s0 + $0xf0] ss:$20 sps:$4 sm:$0xff]  }
  0x16   :  { %1223 = vmatprep.subr.bf16.mxu1 %v1362_v21  ;;  %v1410_v61 = vld [vmem:[%s1773_s0 + $0xd4] ss:$20 sps:$4 sm:$0xff]   ;;  %v1417_v1 = vld [vmem:[%s1773_s0 + $0xfc] ss:$20 sps:$4 sm:$0xff]   ;;  %v1420_v3 = vld [vmem:[%s1773_s0 + $0xf8] ss:$20 sps:$4 sm:$0xff]  }
  0x17   :  { %v1412_v62 = vld [vmem:[%s1773_s0 + $0xc8] ss:$20 sps:$4 sm:$0xff]   ;;  %v1424_v5 = vld [vmem:[%s1773_s0 + $0x124] ss:$20 sps:$4 sm:$0xff]   ;;  %v1427_v7 = vld [vmem:[%s1773_s0 + $0x120] ss:$20 sps:$4 sm:$0xff]  }
  0x18   :  { %1160 = vmatpush3.bf16.msra.mxu0 %v1363_v22  ;;  %v1415_v0 = vld [vmem:[%s1773_s0 + $0xf4] ss:$20 sps:$4 sm:$0xff]   ;;  %v1422_v4 = vld [vmem:[%s1773_s0 + $0x11c] ss:$20 sps:$4 sm:$0xff]   ;;  %v1426_v6 = vld [vmem:[%s1773_s0 + $0x118] ss:$20 sps:$4 sm:$0xff]  }
  0x19   :  { %1224 = vmatpush3.bf16.msra.mxu1 %v1364_v23  ;;  %1161 = vmatprep.subr.bf16.mxu0 %v1365_v24  ;;  %v1429_v8 = vld [vmem:[%s1773_s0 + $0x10] ss:$20 sps:$4 sm:$0xff]   ;;  %v1431_v10 = vld [vmem:[%s1773_s0 + $0x38] ss:$20 sps:$4 sm:$0xff]   ;;  %v1433_v12 = vld [vmem:[%s1773_s0 + $0x60] ss:$20 sps:$4 sm:$0xff]  }
  0x1a   :  { %1225 = vmatprep.subr.bf16.mxu1 %v1366_v25  ;;  %v1430_v9 = vld [vmem:[%s1773_s0 + $0xb0] ss:$20 sps:$4 sm:$0xff]   ;;  %v1432_v11 = vld [vmem:[%s1773_s0 + $0xd8] ss:$20 sps:$4 sm:$0xff]   ;;  %v1434_v13 = vld [vmem:[%s1773_s0 + $0x100] ss:$20 sps:$4 sm:$0xff]  }
  0x1b   :  { %v1435_v14 = vld [vmem:[%s1773_s0 + $0x88] ss:$20 sps:$4 sm:$0xff]   ;;  %v1700_v18 = vld [vmem:[%s1774_s2] ss:$0 sm:$0xff] }
  0x1c   :  { %1162 = vmatpush3.bf16.msra.mxu0 %v1367_v26  ;;  %v1436_v15 = vld [vmem:[%s1773_s0 + $0x128] ss:$20 sps:$4 sm:$0xff]  }
  0x1d   :  { %1226 = vmatpush3.bf16.msra.mxu1 %v1368_v27  ;;  %1163 = vmatprep.subr.bf16.mxu0 %v1369_v28 }
  0x1e   :  { %1227 = vmatprep.subr.bf16.mxu1 %v1370_v29 }
  0x20   :  { %1164 = vmatpush3.bf16.msra.mxu0 %v1371_v30 }
  0x21   :  { %1228 = vmatpush3.bf16.msra.mxu1 %v1372_v31  ;;  %1293 = vmatprep.subr.bf16.mxu0 %v1379_v36 }
  0x22   :  { %1325 = vmatprep.subr.bf16.mxu1 %v1379_v36 }
  0x23   :  { %631 = vmatmul.mubr.bf16.vlgmr.msra.gmra.mrb[0].mxu0 %v1373_v32 }
  0x24   :  { %728 = vmatmul.mubr.bf16.vlgmr.msra.gmra.mrb[0].mxu1 %v1376_v34  ;;  %1294 = vmatpush3.bf16.msra.mxu0 %v1379_v36 }
  0x25   :  { %1333 = vmatpush3.bf16.msra.mxu1 %v1379_v36  ;;  %638 = vmatprep.mubr.bf16.mxu0 %v1380_v37 }
  0x26   :  { %735 = vmatprep.mubr.bf16.mxu1 %v1382_v38  ;;  %1295 = vmatprep.subr.bf16.mxu0 %v1386_v39 }
  0x27   :  { %1326 = vmatprep.subr.bf16.mxu1 %v1386_v39 }
  0x28   :  { %1296 = vmatpush3.bf16.msra.mxu0 %v1386_v39 }
  0x29   :  { %1334 = vmatpush3.bf16.msra.mxu1 %v1386_v39  ;;  %1297 = vmatprep.subr.bf16.mxu0 %v1393_v44 }
  0x2a   :  { %1327 = vmatprep.subr.bf16.mxu1 %v1393_v44 }
  0x2b   :  { %639 = vmatmul.mubr.bf16.gmra.mrb[4].mxu0 %v1384_v40 }
  0x2c   :  { %736 = vmatmul.mubr.bf16.gmra.mrb[4].mxu1 %v1385_v41  ;;  %646 = vmatprep.mubr.bf16.mxu0 %v1387_v42 }
  0x2d   :  { %743 = vmatprep.mubr.bf16.mxu1 %v1389_v43  ;;  %1298 = vmatpush3.bf16.msra.mxu0 %v1393_v44 }
  0x2e   :  { %1335 = vmatpush3.bf16.msra.mxu1 %v1393_v44  ;;  %1299 = vmatprep.subr.bf16.mxu0 %v1400_v45 }
  0x2f   :  { %1328 = vmatprep.subr.bf16.mxu1 %v1400_v45 }
  0x31   :  { %1300 = vmatpush3.bf16.msra.mxu0 %v1400_v45 }
  0x32   :  { %1336 = vmatpush3.bf16.msra.mxu1 %v1400_v45  ;;  %1301 = vmatprep.subr.bf16.mxu0 %v1407_v50 }
  0x33   :  { %647 = vmatmul.mubr.bf16.gmra.mrb[8].mxu0 %v1391_v46  ;;  %1329 = vmatprep.subr.bf16.mxu1 %v1407_v50 }
  0x34   :  { %744 = vmatmul.mubr.bf16.gmra.mrb[8].mxu1 %v1392_v47  ;;  %654 = vmatprep.mubr.bf16.mxu0 %v1394_v48 }
  0x35   :  { %751 = vmatprep.mubr.bf16.mxu1 %v1396_v49  ;;  %1302 = vmatpush3.bf16.msra.mxu0 %v1407_v50 }
  0x36   :  { %1337 = vmatpush3.bf16.msra.mxu1 %v1407_v50  ;;  %1303 = vmatprep.subr.bf16.mxu0 %v1414_v51 }
  0x37   :  { %1330 = vmatprep.subr.bf16.mxu1 %v1414_v51 }
  0x39   :  { %1304 = vmatpush3.bf16.msra.mxu0 %v1414_v51 }
  0x3a   :  { %1338 = vmatpush3.bf16.msra.mxu1 %v1414_v51  ;;  %1305 = vmatprep.subr.bf16.mxu0 %v1421_v55 }
  0x3b   :  { %655 = vmatmul.mubr.bf16.gmra.mrb[12].mxu0 %v1398_v52  ;;  %1331 = vmatprep.subr.bf16.mxu1 %v1421_v55 }
  0x3c   :  { %752 = vmatmul.mubr.bf16.gmra.mrb[12].mxu1 %v1399_v53  ;;  %662 = vmatprep.mubr.bf16.mxu0 %v1401_v54 }
  0x3d   :  { %759 = vmatprep.mubr.bf16.mxu1 %v1403_v56  ;;  %1306 = vmatpush3.bf16.msra.mxu0 %v1421_v55 }
  0x3e   :  { %1339 = vmatpush3.bf16.msra.mxu1 %v1421_v55  ;;  %1307 = vmatprep.subr.bf16.mxu0 %v1428_v57 }
  0x3f   :  { %1332 = vmatprep.subr.bf16.mxu1 %v1428_v57 }
  0x41   :  { %1308 = vmatpush3.bf16.msra.mxu0 %v1428_v57 }
  0x42   :  { %1340 = vmatpush3.bf16.msra.mxu1 %v1428_v57 }
  0x43   :  { %663 = vmatmul.mubr.bf16.gmra.mrb[16].mxu0 %v1405_v58 }
  0x44   :  { %760 = vmatmul.mubr.bf16.gmra.mrb[16].mxu1 %v1406_v59  ;;  %670 = vmatprep.mubr.bf16.mxu0 %v1408_v60 }
  0x45   :  { %767 = vmatprep.mubr.bf16.mxu1 %v1410_v61 }
  0x4b   :  { %671 = vmatmul.mubr.bf16.gmra.mrb[20].mxu0 %v1412_v62 }
  0x4c   :  { %768 = vmatmul.mubr.bf16.gmra.mrb[20].mxu1 %v1413_v63  ;;  %678 = vmatprep.mubr.bf16.mxu0 %v1415_v0 }
  0x4d   :  { %775 = vmatprep.mubr.bf16.mxu1 %v1417_v1 }
  0x53   :  { %679 = vmatmul.mubr.bf16.gmra.mrb[24].mxu0 %v1419_v2 }
  0x54   :  { %776 = vmatmul.mubr.bf16.gmra.mrb[24].mxu1 %v1420_v3  ;;  %686 = vmatprep.mubr.bf16.mxu0 %v1422_v4 }
  0x55   :  { %783 = vmatprep.mubr.bf16.mxu1 %v1424_v5 }
  0x5b   :  { %687 = vmatmul.mubr.bf16.gmra.mrb[28].mxu0 %v1426_v6 }
  0x5c   :  { %784 = vmatmul.mubr.bf16.gmra.mrb[28].mxu1 %v1427_v7  ;;  %1309 = vmatprep.mubr.bf16.mxu0 %v1429_v8 }
  0x5d   :  { %1317 = vmatprep.mubr.bf16.mxu1 %v1430_v9 }
  0x63   :  { %1310 = vmatmul.mubr.bf16.vlgmr.msra.gmra.mrb[32].mxu0 %v1431_v10 }
  0x64   :  { %1318 = vmatmul.mubr.bf16.vlgmr.msra.gmra.mrb[32].mxu1 %v1432_v11  ;;  %1313 = vmatprep.mubr.bf16.mxu0 %v1433_v12 }
  0x65   :  { %1321 = vmatprep.mubr.bf16.mxu1 %v1434_v13 }
  0x6b   :  { %1314 = vmatmul.mubr.bf16.gmra.mrb[36].mxu0 %v1435_v14 }
  0x6c   :  { %1322 = vmatmul.mubr.bf16.gmra.mrb[36].mxu1 %v1436_v15 }
  0xf6   :  { %v1165_v16 = vpop.f32.mrb[0].mxu0 }
  0xf7   :  { %v1229_v17 = vpop.f32.mrb[0].mxu1  ;;  %v1166_v19 = vpop.f32.mrb[1].mxu0 }
  0xf8   :  { %v1167_v20 = vadd.f32 %v1166_v19, %v1165_v16  ;;  %v1230_v21 = vpop.f32.mrb[1].mxu1  ;;  %v1168_v22 = vpop.f32.mrb[2].mxu0 }
  0xf9   :  { %v1231_v23 = vadd.f32 %v1230_v21, %v1229_v17  ;;  %v1232_v24 = vpop.f32.mrb[2].mxu1  ;;  %v1169_v25 = vpop.f32.mrb[3].mxu0 }
  0xfa   :  { %v633_v26 = vadd.f32 %v1167_v20, %v1700_v18  ;;  %v1170_v27 = vadd.f32 %v1169_v25, %v1168_v22  ;;  %v1233_v28 = vpop.f32.mrb[3].mxu1 }
  0xfb   :  { %v1234_v29 = vadd.f32 %v1233_v28, %v1232_v24 }
  0xfc   :  { %v636_v30 = vadd.f32 %v1170_v27, %v1700_v18  ;;  %v1704_v31 = vadd.f32 %v1231_v23, %v633_v26 }
  0xfe   :  { %v1171_v32 = vpop.f32.mrb[4].mxu0  ;;  %v1706_v33 = vadd.f32 %v1234_v29, %v636_v30 }
  0xff   :  { %v1235_v34 = vpop.f32.mrb[4].mxu1  ;;  %v1172_v35 = vpop.f32.mrb[5].mxu0 }
 0x100   :  { %v1173_v36 = vadd.f32 %v1172_v35, %v1171_v32  ;;  %v1236_v37 = vpop.f32.mrb[5].mxu1  ;;  %v1174_v38 = vpop.f32.mrb[6].mxu0 }
 0x101   :  { %v1237_v39 = vadd.f32 %v1236_v37, %v1235_v34  ;;  %v1238_v40 = vpop.f32.mrb[6].mxu1  ;;  %v1175_v41 = vpop.f32.mrb[7].mxu0 }
 0x102   :  { %v641_v42 = vadd.f32 %v1173_v36, %v1700_v18  ;;  %v1176_v43 = vadd.f32 %v1175_v41, %v1174_v38  ;;  %v1239_v44 = vpop.f32.mrb[7].mxu1 }
 0x103   :  { %v1240_v45 = vadd.f32 %v1239_v44, %v1238_v40 }
 0x104   :  { %v644_v46 = vadd.f32 %v1176_v43, %v1700_v18  ;;  %v1710_v47 = vadd.f32 %v1237_v39, %v641_v42 }
 0x106   :  { %v1177_v48 = vpop.f32.mrb[8].mxu0  ;;  %v1712_v49 = vadd.f32 %v1240_v45, %v644_v46 }
 0x107   :  { %v1241_v50 = vpop.f32.mrb[8].mxu1  ;;  %v1178_v51 = vpop.f32.mrb[9].mxu0 }
 0x108   :  { %v1179_v52 = vadd.f32 %v1178_v51, %v1177_v48  ;;  %v1242_v53 = vpop.f32.mrb[9].mxu1  ;;  %v1180_v54 = vpop.f32.mrb[10].mxu0 }
 0x109   :  { %v1243_v55 = vadd.f32 %v1242_v53, %v1241_v50  ;;  %v1244_v56 = vpop.f32.mrb[10].mxu1  ;;  %v1181_v57 = vpop.f32.mrb[11].mxu0 }
 0x10a   :  { %v649_v58 = vadd.f32 %v1179_v52, %v1700_v18  ;;  %v1182_v59 = vadd.f32 %v1181_v57, %v1180_v54  ;;  %v1245_v60 = vpop.f32.mrb[11].mxu1 }
 0x10b   :  { %v1246_v61 = vadd.f32 %v1245_v60, %v1244_v56 }
 0x10c   :  { %v652_v62 = vadd.f32 %v1182_v59, %v1700_v18  ;;  %v1716_v63 = vadd.f32 %v1243_v55, %v649_v58 }
 0x10e   :  { %v1183_v0 = vpop.f32.mrb[12].mxu0  ;;  %v1718_v1 = vadd.f32 %v1246_v61, %v652_v62 }
 0x10f   :  { %v1247_v2 = vpop.f32.mrb[12].mxu1  ;;  %v1184_v3 = vpop.f32.mrb[13].mxu0 }
 0x110   :  { %v1185_v4 = vadd.f32 %v1184_v3, %v1183_v0  ;;  %v1248_v5 = vpop.f32.mrb[13].mxu1  ;;  %v1186_v6 = vpop.f32.mrb[14].mxu0 }
 0x111   :  { %v1249_v7 = vadd.f32 %v1248_v5, %v1247_v2  ;;  %v1250_v8 = vpop.f32.mrb[14].mxu1  ;;  %v1187_v9 = vpop.f32.mrb[15].mxu0 }
 0x112   :  { %v657_v10 = vadd.f32 %v1185_v4, %v1700_v18  ;;  %v1188_v11 = vadd.f32 %v1187_v9, %v1186_v6  ;;  %v1251_v12 = vpop.f32.mrb[15].mxu1 }
 0x113   :  { %v1252_v13 = vadd.f32 %v1251_v12, %v1250_v8 }
 0x114   :  { %v660_v14 = vadd.f32 %v1188_v11, %v1700_v18  ;;  %v1722_v15 = vadd.f32 %v1249_v7, %v657_v10 }
 0x116   :  { %v1189_v16 = vpop.f32.mrb[16].mxu0  ;;  %v1724_v17 = vadd.f32 %v1252_v13, %v660_v14 }
 0x117   :  { %v1253_v19 = vpop.f32.mrb[16].mxu1  ;;  %v1190_v20 = vpop.f32.mrb[17].mxu0 }
 0x118   :  { %v1191_v21 = vadd.f32 %v1190_v20, %v1189_v16  ;;  %v1254_v22 = vpop.f32.mrb[17].mxu1  ;;  %v1192_v23 = vpop.f32.mrb[18].mxu0 }
 0x119   :  { %v1255_v24 = vadd.f32 %v1254_v22, %v1253_v19  ;;  %v1256_v25 = vpop.f32.mrb[18].mxu1  ;;  %v1193_v26 = vpop.f32.mrb[19].mxu0 }
 0x11a   :  { %v665_v27 = vadd.f32 %v1191_v21, %v1700_v18  ;;  %v1194_v28 = vadd.f32 %v1193_v26, %v1192_v23  ;;  %v1257_v29 = vpop.f32.mrb[19].mxu1 }
 0x11b   :  { %v1258_v30 = vadd.f32 %v1257_v29, %v1256_v25 }
 0x11c   :  { %v668_v32 = vadd.f32 %v1194_v28, %v1700_v18  ;;  %v762_v34 = vadd.f32 %v1255_v24, %v665_v27 }
 0x11e   :  { %v1195_v35 = vpop.f32.mrb[20].mxu0  ;;  %v1728_v36 = vadd.f32 %v1258_v30, %v668_v32 }
 0x11f   :  { %v1259_v37 = vpop.f32.mrb[20].mxu1  ;;  %v1196_v38 = vpop.f32.mrb[21].mxu0 }
 0x120   :  { %v1197_v39 = vadd.f32 %v1196_v38, %v1195_v35  ;;  %v1260_v40 = vpop.f32.mrb[21].mxu1  ;;  %v1198_v41 = vpop.f32.mrb[22].mxu0 }
 0x121   :  { %v1261_v42 = vadd.f32 %v1260_v40, %v1259_v37  ;;  %v1262_v43 = vpop.f32.mrb[22].mxu1  ;;  %v1199_v44 = vpop.f32.mrb[23].mxu0 }
 0x122   :  { %v673_v45 = vadd.f32 %v1197_v39, %v1700_v18  ;;  %v1200_v46 = vadd.f32 %v1199_v44, %v1198_v41  ;;  %v1263_v48 = vpop.f32.mrb[23].mxu1 }
 0x123   :  { %v1264_v50 = vadd.f32 %v1263_v48, %v1262_v43 }
 0x124   :  { %v676_v51 = vadd.f32 %v1200_v46, %v1700_v18  ;;  %v770_v52 = vadd.f32 %v1261_v42, %v673_v45 }
 0x126   :  { %v1201_v53 = vpop.f32.mrb[24].mxu0  ;;  %v773_v54 = vadd.f32 %v1264_v50, %v676_v51 }
 0x127   :  { %v1265_v55 = vpop.f32.mrb[24].mxu1  ;;  %v1202_v56 = vpop.f32.mrb[25].mxu0 }
 0x128   :  { %v1203_v57 = vadd.f32 %v1202_v56, %v1201_v53  ;;  %v1266_v58 = vpop.f32.mrb[25].mxu1  ;;  %v1204_v59 = vpop.f32.mrb[26].mxu0 }
 0x129   :  { %v1267_v60 = vadd.f32 %v1266_v58, %v1265_v55  ;;  %v1268_v61 = vpop.f32.mrb[26].mxu1  ;;  %v1205_v62 = vpop.f32.mrb[27].mxu0 }
 0x12a   :  { %v681_v0 = vadd.f32 %v1203_v57, %v1700_v18  ;;  %v1206_v2 = vadd.f32 %v1205_v62, %v1204_v59  ;;  %v1269_v3 = vpop.f32.mrb[27].mxu1 }
 0x12b   :  { %v1270_v4 = vadd.f32 %v1269_v3, %v1268_v61 }
 0x12c   :  { %v684_v5 = vadd.f32 %v1206_v2, %v1700_v18  ;;  %v778_v6 = vadd.f32 %v1267_v60, %v681_v0 }
 0x12e   :  { %v1207_v7 = vpop.f32.mrb[28].mxu0  ;;  %v1734_v8 = vadd.f32 %v1270_v4, %v684_v5 }
 0x12f   :  { %v1271_v9 = vpop.f32.mrb[28].mxu1  ;;  %v1208_v10 = vpop.f32.mrb[29].mxu0 }
 0x130   :  { %v1209_v11 = vadd.f32 %v1208_v10, %v1207_v7  ;;  %v1272_v12 = vpop.f32.mrb[29].mxu1  ;;  %v1210_v13 = vpop.f32.mrb[30].mxu0 }
 0x131   :  { %v1273_v14 = vadd.f32 %v1272_v12, %v1271_v9  ;;  %v1274_v16 = vpop.f32.mrb[30].mxu1  ;;  %v1211_v19 = vpop.f32.mrb[31].mxu0 }
 0x132   :  { %v689_v20 = vadd.f32 %v1209_v11, %v1700_v18  ;;  %v1212_v21 = vadd.f32 %v1211_v19, %v1210_v13  ;;  %v1275_v22 = vpop.f32.mrb[31].mxu1 }
 0x133   :  { %v1276_v23 = vadd.f32 %v1275_v22, %v1274_v16 }
 0x134   :  { %v692_v24 = vadd.f32 %v1212_v21, %v1700_v18  ;;  %v786_v25 = vadd.f32 %v1273_v14, %v689_v20 }
 0x136   :  { %v1311_v26 = vpop.f32.mrb[32].mxu0  ;;  %v789_v27 = vadd.f32 %v1276_v23, %v692_v24 }
 0x137   :  { %v835_v28 = vadd.f32 %v1311_v26, %v1710_v47  ;;  %v1319_v29 = vpop.f32.mrb[32].mxu1  ;;  %v826_v30 = vpop.f32.mrb[33].mxu0 }
 0x138   :  { %v867_v32 = vadd.f32 %v1319_v29, %v770_v52  ;;  %v827_v35 = vadd.f32 %v826_v30, %v1704_v31  ;;  %v858_v37 = vpop.f32.mrb[33].mxu1  ;;  %v1312_v38 = vpop.f32.mrb[34].mxu0 }
 0x139   :  { %v859_v39 = vadd.f32 %v858_v37, %v762_v34  ;;  %v838_v40 = vadd.f32 %v1312_v38, %v1712_v49  ;;  %v1320_v41 = vpop.f32.mrb[34].mxu1  ;;  %v829_v42 = vpop.f32.mrb[35].mxu0  ;;  %v891_v45 = vmax.f32 %v835_v28, 0.0 }
 0x13a   :  { %v870_v43 = vadd.f32 %v1320_v41, %v773_v54  ;;  %v830_v18 = vadd.f32 %v829_v42, %v1706_v33  ;;  %v861_v44 = vpop.f32.mrb[35].mxu1  ;;  %v899_v48 = vmax.f32 %v867_v32, 0.0  ;;  %v889_v50 = vmax.f32 %v827_v35, 0.0 }
 0x13b   :  { %v892_v46 = vmax.f32 %v838_v40, 0.0  ;;  %v862_v47 = vadd.f32 %v861_v44, %v1728_v36  ;;  %v897_v31 = vmax.f32 %v859_v39, 0.0 }
 0x13c   :  { %v900_v51 = vmax.f32 %v870_v43, 0.0  ;;  %v890_v52 = vmax.f32 %v830_v18, 0.0 }
 0x13d   :  { %v1110_v53 = vpack.c.bf16 %v892_v46, %v891_v45  ;;  %v898_v55 = vmax.f32 %v862_v47, 0.0 }
 0x13e   :  { %v1130_v34 = vpack.c.bf16 %v900_v51, %v899_v48  ;;  %v1105_v56 = vpack.c.bf16 %v890_v52, %v889_v50  ;;  %v1315_v49 = vpop.f32.mrb[36].mxu0 }
 0x13f   :  { %1142 = vst [vmem:[%s1775_s3 + $0x8] sm:$0xff] %v1110_v53   ;;  %v1125_v33 = vpack.c.bf16 %v898_v55, %v897_v31  ;;  %v851_v54 = vadd.f32 %v1315_v49, %v1722_v15  ;;  %v1323_v57 = vpop.f32.mrb[36].mxu1  ;;  %v842_v58 = vpop.f32.mrb[37].mxu0 }
 0x140   :  { %1146 = vst [vmem:[%s1775_s3 + $0x28] sm:$0xff] %v1130_v34   ;;  %1106 = vst [vmem:[%s1775_s3] sm:$0xff] %v1105_v56   ;;  %v883_v36 = vadd.f32 %v1323_v57, %v786_v25  ;;  %v843_v59 = vadd.f32 %v842_v58, %v1716_v63  ;;  %v874_v60 = vpop.f32.mrb[37].mxu1  ;;  %v1316_v61 = vpop.f32.mrb[38].mxu0 }
 0x141   :  { %1145 = vst [vmem:[%s1775_s3 + $0x20] sm:$0xff] %v1125_v33   ;;  %v875_v15 = vadd.f32 %v874_v60, %v778_v6  ;;  %v854_v62 = vadd.f32 %v1316_v61, %v1724_v17  ;;  %v1324_v0 = vpop.f32.mrb[38].mxu1  ;;  %v845_v2 = vpop.f32.mrb[39].mxu0  ;;  %v895_v7 = vmax.f32 %v851_v54, 0.0 }
 0x142   :  { %v886_v3 = vadd.f32 %v1324_v0, %v789_v27  ;;  %v846_v4 = vadd.f32 %v845_v2, %v1718_v1  ;;  %v877_v5 = vpop.f32.mrb[39].mxu1  ;;  %v903_v63 = vmax.f32 %v883_v36, 0.0  ;;  %v893_v11 = vmax.f32 %v843_v59, 0.0 }
 0x143   :  { %v896_v9 = vmax.f32 %v854_v62, 0.0  ;;  %v878_v10 = vadd.f32 %v877_v5, %v1734_v8  ;;  %v901_v14 = vmax.f32 %v875_v15, 0.0 }
 0x144   :  { %v904_v12 = vmax.f32 %v886_v3, 0.0  ;;  %v894_v13 = vmax.f32 %v846_v4, 0.0 }
 0x145   :  { %v1120_v16 = vpack.c.bf16 %v896_v9, %v895_v7  ;;  %v902_v19 = vmax.f32 %v878_v10, 0.0 }
 0x146   :  { %v1140_v6 = vpack.c.bf16 %v904_v12, %v903_v63  ;;  %v1115_v20 = vpack.c.bf16 %v894_v13, %v893_v11 }
 0x147   :  { %1144 = vst [vmem:[%s1775_s3 + $0x18] sm:$0xff] %v1120_v16   ;;  %v1135_v17 = vpack.c.bf16 %v902_v19, %v901_v14 }
 0x148   :  { %1148 = vst [vmem:[%s1775_s3 + $0x38] sm:$0xff] %v1140_v6   ;;  %1143 = vst [vmem:[%s1775_s3 + $0x10] sm:$0xff] %v1115_v20  }
 0x149   :  { %1147 = vst [vmem:[%s1775_s3 + $0x30] sm:$0xff] %v1135_v17  }

// kernel: _lambda_.9
= control target key start
LH: loop header
LB: loop body
LE: loop exit
PB: predicated region body
PF: predicated region fallthrough
CT: control target
= control target key end

     0   :  { %v2693_v0 = vmov 0   ;;  %s3391_s1 = inlined_call_operand.vmem [shape: bf16[384,128], index: 1, kind: input, shape index: {}]   ;;  %s3392_s0 = inlined_call_operand.vmem [shape: bf16[512,384], index: 0, kind: input, shape index: {}]   ;;  %s3393_s2 = inlined_call_operand.vmem [shape: f32[1,128], index: 2, kind: input, shape index: {}]   ;;  %s3394_s3 = inlined_call_operand.vmem [shape: bf16[512,128], index: 3, kind: output, shape index: {}]  }
   0x1   :  { %854 = vmatprep.subr.bf16.mxu0 %v2693_v0  ;;  %2380 = vmatprep.subr.bf16.mxu1 %v2693_v0  ;;  %v2413_v1 = vld [vmem:[%s3391_s1] sm:$0xff]   ;;  %v2414_v2 = vld [vmem:[%s3391_s1 + $0x8] sm:$0xff]   ;;  %v2415_v3 = vld [vmem:[%s3391_s1 + $0x10] sm:$0xff]  }
   0x2   :  { %855 = vmatpush1.bf16.msra.mxu0 %v2413_v1  ;;  %2396 = vmatpush1.bf16.msra.mxu1 %v2413_v1  ;;  %v2416_v4 = vld [vmem:[%s3391_s1 + $0x18] sm:$0xff]   ;;  %v2417_v5 = vld [vmem:[%s3391_s1 + $0x20] sm:$0xff]   ;;  %v2418_v7 = vld [vmem:[%s3391_s1 + $0x28] sm:$0xff]  }
   0x3   :  { %856 = vmatprep.subr.bf16.mxu0 %v2693_v0  ;;  %2381 = vmatprep.subr.bf16.mxu1 %v2693_v0  ;;  %v2431_v6 = vld [vmem:[%s3392_s0 + $0x4] ss:$12 sps:$4 sm:$0xff]   ;;  %v2420_v10 = vld [vmem:[%s3391_s1 + $0x38] sm:$0xff]   ;;  %v2422_v12 = vld [vmem:[%s3391_s1 + $0x48] sm:$0xff]  }
   0x4   :  { %v2434_v8 = vld [vmem:[%s3392_s0 + $0x244] ss:$12 sps:$4 sm:$0xff]   ;;  %886 = vmatprep.mubr.bf16.mxu0 %v2431_v6  ;;  %v2424_v14 = vld [vmem:[%s3391_s1 + $0x58] sm:$0xff]   ;;  %v2426_v16 = vld [vmem:[%s3391_s1 + $0x68] sm:$0xff]  }
   0x5   :  { %1078 = vmatprep.mubr.bf16.mxu1 %v2434_v8  ;;  %v2419_v9 = vld [vmem:[%s3391_s1 + $0x30] sm:$0xff]   ;;  %v2421_v11 = vld [vmem:[%s3391_s1 + $0x40] sm:$0xff]   ;;  %v2428_v18 = vld [vmem:[%s3391_s1 + $0x78] sm:$0xff]  }
   0x6   :  { %857 = vmatpush1.bf16.msra.mxu0 %v2414_v2  ;;  %2397 = vmatpush1.bf16.msra.mxu1 %v2414_v2  ;;  %v2423_v13 = vld [vmem:[%s3391_s1 + $0x50] sm:$0xff]   ;;  %v2425_v15 = vld [vmem:[%s3391_s1 + $0x60] sm:$0xff]   ;;  %v2436_v22 = vld [vmem:[%s3392_s0 + $0x1c] ss:$12 sps:$4 sm:$0xff]  }
   0x7   :  { %858 = vmatprep.subr.bf16.mxu0 %v2693_v0  ;;  %2382 = vmatprep.subr.bf16.mxu1 %v2693_v0  ;;  %v2427_v17 = vld [vmem:[%s3391_s1 + $0x70] sm:$0xff]   ;;  %v2435_v19 = vld [vmem:[%s3391_s1 + $0x80] sm:$0xff]   ;;  %v2438_v23 = vld [vmem:[%s3392_s0 + $0x25c] ss:$12 sps:$4 sm:$0xff]  }
   0x8   :  { %v2429_v20 = vld [vmem:[%s3392_s0] ss:$12 sps:$4 sm:$0xff]   ;;  %v2449_v25 = vld [vmem:[%s3391_s1 + $0x90] sm:$0xff]   ;;  %v2440_v26 = vld [vmem:[%s3392_s0 + $0x18] ss:$12 sps:$4 sm:$0xff]  }
   0x9   :  { %v2432_v21 = vld [vmem:[%s3392_s0 + $0x240] ss:$12 sps:$4 sm:$0xff]   ;;  %v2441_v27 = vld [vmem:[%s3392_s0 + $0x258] ss:$12 sps:$4 sm:$0xff]   ;;  %v2447_v31 = vld [vmem:[%s3392_s0 + $0x30] ss:$12 sps:$4 sm:$0xff]  }
   0xa   :  { %859 = vmatpush1.bf16.msra.mxu0 %v2415_v3  ;;  %2398 = vmatpush1.bf16.msra.mxu1 %v2415_v3  ;;  %v2442_v24 = vld [vmem:[%s3391_s1 + $0x88] sm:$0xff]   ;;  %v2443_v28 = vld [vmem:[%s3392_s0 + $0x34] ss:$12 sps:$4 sm:$0xff]   ;;  %v2456_v30 = vld [vmem:[%s3391_s1 + $0x98] sm:$0xff]  }
   0xb   :  { %860 = vmatprep.subr.bf16.mxu0 %v2693_v0  ;;  %2383 = vmatprep.subr.bf16.mxu1 %v2693_v0  ;;  %v2445_v29 = vld [vmem:[%s3392_s0 + $0x274] ss:$12 sps:$4 sm:$0xff]   ;;  %v2448_v33 = vld [vmem:[%s3392_s0 + $0x270] ss:$12 sps:$4 sm:$0xff]   ;;  %v2450_v34 = vld [vmem:[%s3392_s0 + $0x4c] ss:$12 sps:$4 sm:$0xff]  }
   0xc   :  { %v2463_v32 = vld [vmem:[%s3391_s1 + $0xa0] sm:$0xff]   ;;  %v2452_v35 = vld [vmem:[%s3392_s0 + $0x28c] ss:$12 sps:$4 sm:$0xff]   ;;  %v2454_v37 = vld [vmem:[%s3392_s0 + $0x48] ss:$12 sps:$4 sm:$0xff]  }
   0xd   :  { %v2470_v36 = vld [vmem:[%s3391_s1 + $0xa8] sm:$0xff]   ;;  %v2457_v39 = vld [vmem:[%s3392_s0 + $0x64] ss:$12 sps:$4 sm:$0xff]   ;;  %v2484_v42 = vld [vmem:[%s3391_s1 + $0xb8] sm:$0xff]  }
   0xe   :  { %861 = vmatpush1.bf16.msra.mxu0 %v2416_v4  ;;  %2399 = vmatpush1.bf16.msra.mxu1 %v2416_v4  ;;  %v2455_v38 = vld [vmem:[%s3392_s0 + $0x288] ss:$12 sps:$4 sm:$0xff]   ;;  %v2459_v40 = vld [vmem:[%s3392_s0 + $0x2a4] ss:$12 sps:$4 sm:$0xff]   ;;  %v2461_v43 = vld [vmem:[%s3392_s0 + $0x60] ss:$12 sps:$4 sm:$0xff]  }
   0xf   :  { %862 = vmatprep.subr.bf16.mxu0 %v2693_v0  ;;  %2384 = vmatprep.subr.bf16.mxu1 %v2693_v0  ;;  %v2477_v41 = vld [vmem:[%s3391_s1 + $0xb0] sm:$0xff]   ;;  %v2462_v44 = vld [vmem:[%s3392_s0 + $0x2a0] ss:$12 sps:$4 sm:$0xff]   ;;  %v2464_v45 = vld [vmem:[%s3392_s0 + $0x7c] ss:$12 sps:$4 sm:$0xff]  }
  0x10   :  { %v2466_v46 = vld [vmem:[%s3392_s0 + $0x2bc] ss:$12 sps:$4 sm:$0xff]   ;;  %v2468_v47 = vld [vmem:[%s3392_s0 + $0x78] ss:$12 sps:$4 sm:$0xff]   ;;  %v2471_v49 = vld [vmem:[%s3392_s0 + $0x94] ss:$12 sps:$4 sm:$0xff]  }
  0x11   :  { %v2469_v48 = vld [vmem:[%s3392_s0 + $0x2b8] ss:$12 sps:$4 sm:$0xff]   ;;  %v2473_v50 = vld [vmem:[%s3392_s0 + $0x2d4] ss:$12 sps:$4 sm:$0xff]   ;;  %v2475_v51 = vld [vmem:[%s3392_s0 + $0x90] ss:$12 sps:$4 sm:$0xff]  }
  0x12   :  { %863 = vmatpush1.bf16.msra.mxu0 %v2417_v5  ;;  %2400 = vmatpush1.bf16.msra.mxu1 %v2417_v5  ;;  %v2476_v52 = vld [vmem:[%s3392_s0 + $0x2d0] ss:$12 sps:$4 sm:$0xff]   ;;  %v2478_v53 = vld [vmem:[%s3392_s0 + $0xac] ss:$12 sps:$4 sm:$0xff]   ;;  %v2482_v55 = vld [vmem:[%s3392_s0 + $0xa8] ss:$12 sps:$4 sm:$0xff]  }
  0x13   :  { %864 = vmatprep.subr.bf16.mxu0 %v2693_v0  ;;  %2385 = vmatprep.subr.bf16.mxu1 %v2693_v0  ;;  %v2480_v54 = vld [vmem:[%s3392_s0 + $0x2ec] ss:$12 sps:$4 sm:$0xff]   ;;  %v2483_v56 = vld [vmem:[%s3392_s0 + $0x2e8] ss:$12 sps:$4 sm:$0xff]   ;;  %v2485_v57 = vld [vmem:[%s3392_s0 + $0xc4] ss:$12 sps:$4 sm:$0xff]  }
  0x14   :  { %v2487_v58 = vld [vmem:[%s3392_s0 + $0x8] ss:$12 sps:$4 sm:$0xff]   ;;  %v2488_v59 = vld [vmem:[%s3392_s0 + $0xc0] ss:$12 sps:$4 sm:$0xff]   ;;  %v2492_v62 = vld [vmem:[%s3392_s0 + $0x38] ss:$12 sps:$4 sm:$0xff]  }
  0x15   :  { %v2489_v60 = vld [vmem:[%s3392_s0 + $0x20] ss:$12 sps:$4 sm:$0xff]   ;;  %v2490_v61 = vld [vmem:[%s3392_s0 + $0xdc] ss:$12 sps:$4 sm:$0xff]   ;;  %v2493_v63 = vld [vmem:[%s3392_s0 + $0xd8] ss:$12 sps:$4 sm:$0xff]  }
  0x16   :  { %865 = vmatpush1.bf16.msra.mxu0 %v2418_v7  ;;  %2401 = vmatpush1.bf16.msra.mxu1 %v2418_v7  ;;  %v2495_v1 = vld [vmem:[%s3392_s0 + $0xf4] ss:$12 sps:$4 sm:$0xff]   ;;  %v2498_v3 = vld [vmem:[%s3392_s0 + $0xf0] ss:$12 sps:$4 sm:$0xff]   ;;  %v2500_v5 = vld [vmem:[%s3392_s0 + $0x10c] ss:$12 sps:$4 sm:$0xff]  }
  0x17   :  { %866 = vmatprep.subr.bf16.mxu0 %v2693_v0  ;;  %2386 = vmatprep.subr.bf16.mxu1 %v2693_v0  ;;  %v2497_v2 = vld [vmem:[%s3392_s0 + $0x68] ss:$12 sps:$4 sm:$0xff]   ;;  %v2499_v4 = vld [vmem:[%s3392_s0 + $0x80] ss:$12 sps:$4 sm:$0xff]   ;;  %v2502_v6 = vld [vmem:[%s3392_s0 + $0x98] ss:$12 sps:$4 sm:$0xff]  }
  0x18   :  { %v2503_v7 = vld [vmem:[%s3392_s0 + $0x108] ss:$12 sps:$4 sm:$0xff]   ;;  %v2504_v8 = vld [vmem:[%s3392_s0 + $0xb0] ss:$12 sps:$4 sm:$0xff]  }
  0x1a   :  { %867 = vmatpush1.bf16.msra.mxu0 %v2419_v9  ;;  %2402 = vmatpush1.bf16.msra.mxu1 %v2419_v9  ;;  %v2505_v9 = vld [vmem:[%s3392_s0 + $0x124] ss:$12 sps:$4 sm:$0xff]  }
  0x1b   :  { %868 = vmatprep.subr.bf16.mxu0 %v2693_v0  ;;  %2387 = vmatprep.subr.bf16.mxu1 %v2693_v0 }
  0x1e   :  { %869 = vmatpush1.bf16.msra.mxu0 %v2420_v10  ;;  %2403 = vmatpush1.bf16.msra.mxu1 %v2420_v10  ;;  %v2507_v10 = vld [vmem:[%s3392_s0 + $0xc8] ss:$12 sps:$4 sm:$0xff]  }
  0x1f   :  { %870 = vmatprep.subr.bf16.mxu0 %v2693_v0  ;;  %2388 = vmatprep.subr.bf16.mxu1 %v2693_v0 }
  0x22   :  { %871 = vmatpush1.bf16.msra.mxu0 %v2421_v11  ;;  %2404 = vmatpush1.bf16.msra.mxu1 %v2421_v11  ;;  %v2508_v11 = vld [vmem:[%s3392_s0 + $0x120] ss:$12 sps:$4 sm:$0xff]  }
  0x23   :  { %872 = vmatprep.subr.bf16.mxu0 %v2693_v0  ;;  %2389 = vmatprep.subr.bf16.mxu1 %v2693_v0 }
  0x26   :  { %873 = vmatpush1.bf16.msra.mxu0 %v2422_v12  ;;  %2405 = vmatpush1.bf16.msra.mxu1 %v2422_v12  ;;  %v2509_v12 = vld [vmem:[%s3392_s0 + $0xe0] ss:$12 sps:$4 sm:$0xff]  }
  0x27   :  { %874 = vmatprep.subr.bf16.mxu0 %v2693_v0  ;;  %2390 = vmatprep.subr.bf16.mxu1 %v2693_v0 }
  0x2a   :  { %875 = vmatpush1.bf16.msra.mxu0 %v2423_v13  ;;  %2406 = vmatpush1.bf16.msra.mxu1 %v2423_v13  ;;  %v2510_v13 = vld [vmem:[%s3392_s0 + $0x13c] ss:$12 sps:$4 sm:$0xff]  }
  0x2b   :  { %876 = vmatprep.subr.bf16.mxu0 %v2693_v0  ;;  %2391 = vmatprep.subr.bf16.mxu1 %v2693_v0 }
  0x2e   :  { %877 = vmatpush1.bf16.msra.mxu0 %v2424_v14  ;;  %2407 = vmatpush1.bf16.msra.mxu1 %v2424_v14  ;;  %v2512_v14 = vld [vmem:[%s3392_s0 + $0xf8] ss:$12 sps:$4 sm:$0xff]  }
  0x2f   :  { %878 = vmatprep.subr.bf16.mxu0 %v2693_v0  ;;  %2392 = vmatprep.subr.bf16.mxu1 %v2693_v0 }
  0x32   :  { %879 = vmatpush1.bf16.msra.mxu0 %v2425_v15  ;;  %2408 = vmatpush1.bf16.msra.mxu1 %v2425_v15  ;;  %v2513_v15 = vld [vmem:[%s3392_s0 + $0x138] ss:$12 sps:$4 sm:$0xff]  }
  0x33   :  { %880 = vmatprep.subr.bf16.mxu0 %v2693_v0  ;;  %2393 = vmatprep.subr.bf16.mxu1 %v2693_v0 }
  0x36   :  { %881 = vmatpush1.bf16.msra.mxu0 %v2426_v16  ;;  %2409 = vmatpush1.bf16.msra.mxu1 %v2426_v16  ;;  %v2514_v16 = vld [vmem:[%s3392_s0 + $0x110] ss:$12 sps:$4 sm:$0xff]  }
  0x37   :  { %882 = vmatprep.subr.bf16.mxu0 %v2693_v0  ;;  %2394 = vmatprep.subr.bf16.mxu1 %v2693_v0 }
  0x3a   :  { %883 = vmatpush1.bf16.msra.mxu0 %v2427_v17  ;;  %2410 = vmatpush1.bf16.msra.mxu1 %v2427_v17  ;;  %v2515_v17 = vld [vmem:[%s3392_s0 + $0x154] ss:$12 sps:$4 sm:$0xff]  }
  0x3b   :  { %884 = vmatprep.subr.bf16.mxu0 %v2693_v0  ;;  %2395 = vmatprep.subr.bf16.mxu1 %v2693_v0  ;;  %v2494_v0 = vld [vmem:[%s3392_s0 + $0x50] ss:$12 sps:$4 sm:$0xff]  }
  0x3e   :  { %885 = vmatpush1.bf16.msra.mxu0 %v2428_v18  ;;  %2411 = vmatpush1.bf16.msra.mxu1 %v2428_v18  ;;  %v2517_v18 = vld [vmem:[%s3392_s0 + $0x128] ss:$12 sps:$4 sm:$0xff]  }
  0x3f   :  { %2300 = vmatprep.subr.bf16.mxu1 %v2435_v19 }
  0x41   :  { %887 = vmatmul.mubr.bf16.vlgmr.msra.gmra.mrb[0].mxu0 %v2429_v20  ;;  %1079 = vmatmul.mubr.bf16.vlgmr.msra.gmra.mrb[0].mxu1 %v2432_v21  ;;  %v2519_v20 = vld [vmem:[%s3392_s0 + $0x140] ss:$12 sps:$4 sm:$0xff]  }
  0x42   :  { %2301 = vmatpush3.bf16.msra.mxu1 %v2435_v19  ;;  %894 = vmatprep.mubr.bf16.mxu0 %v2436_v22  ;;  %v2518_v19 = vld [vmem:[%s3392_s0 + $0x150] ss:$12 sps:$4 sm:$0xff]   ;;  %v2520_v21 = vld [vmem:[%s3392_s0 + $0x16c] ss:$12 sps:$4 sm:$0xff]  }
  0x43   :  { %1086 = vmatprep.mubr.bf16.mxu1 %v2438_v23  ;;  %2302 = vmatprep.subr.bf16.mxu1 %v2442_v24  ;;  %v2522_v22 = vld [vmem:[%s3392_s0 + $0x158] ss:$12 sps:$4 sm:$0xff]   ;;  %v2523_v23 = vld [vmem:[%s3392_s0 + $0x168] ss:$12 sps:$4 sm:$0xff]  }
  0x46   :  { %2303 = vmatpush3.bf16.msra.mxu1 %v2442_v24  ;;  %v2524_v24 = vld [vmem:[%s3392_s0 + $0x170] ss:$12 sps:$4 sm:$0xff]  }
  0x47   :  { %2304 = vmatprep.subr.bf16.mxu1 %v2449_v25 }
  0x49   :  { %895 = vmatmul.mubr.bf16.gmra.mrb[4].mxu0 %v2440_v26  ;;  %1087 = vmatmul.mubr.bf16.gmra.mrb[4].mxu1 %v2441_v27  ;;  %v2527_v26 = vld [vmem:[%s3392_s0 + $0x188] ss:$12 sps:$4 sm:$0xff]   ;;  %v2528_v27 = vld [vmem:[%s3392_s0 + $0x180] ss:$12 sps:$4 sm:$0xff]  }
  0x4a   :  { %902 = vmatprep.mubr.bf16.mxu0 %v2443_v28  ;;  %1094 = vmatprep.mubr.bf16.mxu1 %v2445_v29  ;;  %v2529_v28 = vld [vmem:[%s3392_s0 + $0x1a0] ss:$12 sps:$4 sm:$0xff]   ;;  %v2530_v29 = vld [vmem:[%s3392_s0 + $0x19c] ss:$12 sps:$4 sm:$0xff]  }
  0x4b   :  { %2305 = vmatpush3.bf16.msra.mxu1 %v2449_v25  ;;  %v2525_v25 = vld [vmem:[%s3392_s0 + $0x184] ss:$12 sps:$4 sm:$0xff]  }
  0x4c   :  { %2306 = vmatprep.subr.bf16.mxu1 %v2456_v30 }
  0x4f   :  { %2307 = vmatpush3.bf16.msra.mxu1 %v2456_v30  ;;  %v2532_v30 = vld [vmem:[%s3392_s0 + $0x1b8] ss:$12 sps:$4 sm:$0xff]  }
  0x50   :  { %2308 = vmatprep.subr.bf16.mxu1 %v2463_v32 }
  0x51   :  { %903 = vmatmul.mubr.bf16.gmra.mrb[8].mxu0 %v2447_v31  ;;  %1095 = vmatmul.mubr.bf16.gmra.mrb[8].mxu1 %v2448_v33  ;;  %v2533_v31 = vld [vmem:[%s3392_s0 + $0x198] ss:$12 sps:$4 sm:$0xff]   ;;  %v2535_v33 = vld [vmem:[%s3392_s0 + $0x1b4] ss:$12 sps:$4 sm:$0xff]  }
  0x52   :  { %910 = vmatprep.mubr.bf16.mxu0 %v2450_v34  ;;  %1102 = vmatprep.mubr.bf16.mxu1 %v2452_v35  ;;  %v2537_v34 = vld [vmem:[%s3392_s0 + $0x1e8] ss:$12 sps:$4 sm:$0xff]   ;;  %v2538_v35 = vld [vmem:[%s3392_s0 + $0x1b0] ss:$12 sps:$4 sm:$0xff]  }
  0x53   :  { %2309 = vmatpush3.bf16.msra.mxu1 %v2463_v32  ;;  %v2534_v32 = vld [vmem:[%s3392_s0 + $0x1d0] ss:$12 sps:$4 sm:$0xff]  }
  0x54   :  { %2310 = vmatprep.subr.bf16.mxu1 %v2470_v36 }
  0x57   :  { %2311 = vmatpush3.bf16.msra.mxu1 %v2470_v36  ;;  %v2539_v36 = vld [vmem:[%s3392_s0 + $0x200] ss:$12 sps:$4 sm:$0xff]  }
  0x58   :  { %2312 = vmatprep.subr.bf16.mxu1 %v2477_v41 }
  0x59   :  { %911 = vmatmul.mubr.bf16.gmra.mrb[12].mxu0 %v2454_v37  ;;  %1103 = vmatmul.mubr.bf16.gmra.mrb[12].mxu1 %v2455_v38  ;;  %v2540_v37 = vld [vmem:[%s3392_s0 + $0x1cc] ss:$12 sps:$4 sm:$0xff]  }
  0x5a   :  { %918 = vmatprep.mubr.bf16.mxu0 %v2457_v39  ;;  %1110 = vmatprep.mubr.bf16.mxu1 %v2459_v40  ;;  %v2542_v38 = vld [vmem:[%s3392_s0 + $0x218] ss:$12 sps:$4 sm:$0xff]   ;;  %v2543_v39 = vld [vmem:[%s3392_s0 + $0x1c8] ss:$12 sps:$4 sm:$0xff]   ;;  %v2544_v40 = vld [vmem:[%s3392_s0 + $0x230] ss:$12 sps:$4 sm:$0xff]  }
  0x5b   :  { %2313 = vmatpush3.bf16.msra.mxu1 %v2477_v41  ;;  %v2545_v41 = vld [vmem:[%s3392_s0 + $0x1e4] ss:$12 sps:$4 sm:$0xff]  }
  0x5c   :  { %2314 = vmatprep.subr.bf16.mxu1 %v2484_v42 }
  0x5f   :  { %2315 = vmatpush3.bf16.msra.mxu1 %v2484_v42  ;;  %v2547_v42 = vld [vmem:[%s3392_s0 + $0x248] ss:$12 sps:$4 sm:$0xff]  }
  0x61   :  { %919 = vmatmul.mubr.bf16.gmra.mrb[16].mxu0 %v2461_v43  ;;  %1111 = vmatmul.mubr.bf16.gmra.mrb[16].mxu1 %v2462_v44  ;;  %v2548_v43 = vld [vmem:[%s3392_s0 + $0x1e0] ss:$12 sps:$4 sm:$0xff]  }
  0x62   :  { %926 = vmatprep.mubr.bf16.mxu0 %v2464_v45  ;;  %1118 = vmatprep.mubr.bf16.mxu1 %v2466_v46  ;;  %v2549_v44 = vld [vmem:[%s3392_s0 + $0x260] ss:$12 sps:$4 sm:$0xff]   ;;  %v2550_v45 = vld [vmem:[%s3392_s0 + $0x1fc] ss:$12 sps:$4 sm:$0xff]   ;;  %v2552_v46 = vld [vmem:[%s3392_s0 + $0x278] ss:$12 sps:$4 sm:$0xff]  }
  0x69   :  { %927 = vmatmul.mubr.bf16.gmra.mrb[20].mxu0 %v2468_v47  ;;  %1119 = vmatmul.mubr.bf16.gmra.mrb[20].mxu1 %v2469_v48  ;;  %v2553_v47 = vld [vmem:[%s3392_s0 + $0x1f8] ss:$12 sps:$4 sm:$0xff]   ;;  %v2554_v48 = vld [vmem:[%s3392_s0 + $0x290] ss:$12 sps:$4 sm:$0xff]  }
  0x6a   :  { %934 = vmatprep.mubr.bf16.mxu0 %v2471_v49  ;;  %1126 = vmatprep.mubr.bf16.mxu1 %v2473_v50  ;;  %v2555_v49 = vld [vmem:[%s3392_s0 + $0x214] ss:$12 sps:$4 sm:$0xff]  }
  0x6b   :  { %v2557_v50 = vld [vmem:[%s3392_s0 + $0x2a8] ss:$12 sps:$4 sm:$0xff]  }
  0x71   :  { %935 = vmatmul.mubr.bf16.gmra.mrb[24].mxu0 %v2475_v51  ;;  %1127 = vmatmul.mubr.bf16.gmra.mrb[24].mxu1 %v2476_v52  ;;  %v2558_v51 = vld [vmem:[%s3392_s0 + $0x210] ss:$12 sps:$4 sm:$0xff]   ;;  %v2559_v52 = vld [vmem:[%s3392_s0 + $0x2c0] ss:$12 sps:$4 sm:$0xff]  }
  0x72   :  { %942 = vmatprep.mubr.bf16.mxu0 %v2478_v53  ;;  %1134 = vmatprep.mubr.bf16.mxu1 %v2480_v54  ;;  %v2560_v53 = vld [vmem:[%s3392_s0 + $0x22c] ss:$12 sps:$4 sm:$0xff]  }
  0x73   :  { %v2562_v54 = vld [vmem:[%s3392_s0 + $0x2d8] ss:$12 sps:$4 sm:$0xff]  }
  0x79   :  { %943 = vmatmul.mubr.bf16.gmra.mrb[28].mxu0 %v2482_v55  ;;  %1135 = vmatmul.mubr.bf16.gmra.mrb[28].mxu1 %v2483_v56  ;;  %v2563_v55 = vld [vmem:[%s3392_s0 + $0x228] ss:$12 sps:$4 sm:$0xff]   ;;  %v2564_v56 = vld [vmem:[%s3392_s0 + $0x2f0] ss:$12 sps:$4 sm:$0xff]  }
  0x7a   :  { %950 = vmatprep.mubr.bf16.mxu0 %v2485_v57  ;;  %2316 = vmatprep.mubr.bf16.mxu1 %v2487_v58 }
  0x81   :  { %951 = vmatmul.mubr.bf16.gmra.mrb[32].mxu0 %v2488_v59  ;;  %2317 = vmatmul.mubr.bf16.vlgmr.msra.gmra.mrb[32].mxu1 %v2489_v60 }
  0x82   :  { %958 = vmatprep.mubr.bf16.mxu0 %v2490_v61  ;;  %2320 = vmatprep.mubr.bf16.mxu1 %v2492_v62 }
  0x89   :  { %959 = vmatmul.mubr.bf16.gmra.mrb[36].mxu0 %v2493_v63  ;;  %2321 = vmatmul.mubr.bf16.gmra.mrb[36].mxu1 %v2494_v0 }
  0x8a   :  { %966 = vmatprep.mubr.bf16.mxu0 %v2495_v1  ;;  %2324 = vmatprep.mubr.bf16.mxu1 %v2497_v2 }
  0x91   :  { %967 = vmatmul.mubr.bf16.gmra.mrb[40].mxu0 %v2498_v3  ;;  %2325 = vmatmul.mubr.bf16.gmra.mrb[40].mxu1 %v2499_v4 }
  0x92   :  { %974 = vmatprep.mubr.bf16.mxu0 %v2500_v5  ;;  %2328 = vmatprep.mubr.bf16.mxu1 %v2502_v6 }
  0x99   :  { %975 = vmatmul.mubr.bf16.gmra.mrb[44].mxu0 %v2503_v7  ;;  %2329 = vmatmul.mubr.bf16.gmra.mrb[44].mxu1 %v2504_v8 }
  0x9a   :  { %982 = vmatprep.mubr.bf16.mxu0 %v2505_v9  ;;  %2332 = vmatprep.mubr.bf16.mxu1 %v2507_v10 }
  0xa1   :  { %983 = vmatmul.mubr.bf16.gmra.mrb[48].mxu0 %v2508_v11  ;;  %2333 = vmatmul.mubr.bf16.gmra.mrb[48].mxu1 %v2509_v12 }
  0xa2   :  { %990 = vmatprep.mubr.bf16.mxu0 %v2510_v13  ;;  %2336 = vmatprep.mubr.bf16.mxu1 %v2512_v14 }
  0xa9   :  { %991 = vmatmul.mubr.bf16.gmra.mrb[52].mxu0 %v2513_v15  ;;  %2337 = vmatmul.mubr.bf16.gmra.mrb[52].mxu1 %v2514_v16 }
  0xaa   :  { %998 = vmatprep.mubr.bf16.mxu0 %v2515_v17  ;;  %2340 = vmatprep.mubr.bf16.mxu1 %v2517_v18 }
  0xb1   :  { %999 = vmatmul.mubr.bf16.gmra.mrb[56].mxu0 %v2518_v19  ;;  %2341 = vmatmul.mubr.bf16.gmra.mrb[56].mxu1 %v2519_v20 }
  0xb2   :  { %1006 = vmatprep.mubr.bf16.mxu0 %v2520_v21  ;;  %2344 = vmatprep.mubr.bf16.mxu1 %v2522_v22 }
  0xb9   :  { %1007 = vmatmul.mubr.bf16.gmra.mrb[60].mxu0 %v2523_v23  ;;  %2345 = vmatmul.mubr.bf16.gmra.mrb[60].mxu1 %v2524_v24 }
  0xba   :  { %1014 = vmatprep.mubr.bf16.mxu0 %v2525_v25  ;;  %2348 = vmatprep.mubr.bf16.mxu1 %v2527_v26 }
  0xc1   :  { %1015 = vmatmul.mubr.bf16.gmra.mrb[64].mxu0 %v2528_v27  ;;  %2349 = vmatmul.mubr.bf16.gmra.mrb[64].mxu1 %v2529_v28 }
  0xc2   :  { %1022 = vmatprep.mubr.bf16.mxu0 %v2530_v29  ;;  %2352 = vmatprep.mubr.bf16.mxu1 %v2532_v30 }
  0xc9   :  { %1023 = vmatmul.mubr.bf16.gmra.mrb[68].mxu0 %v2533_v31  ;;  %2353 = vmatmul.mubr.bf16.gmra.mrb[68].mxu1 %v2534_v32 }
  0xca   :  { %1030 = vmatprep.mubr.bf16.mxu0 %v2535_v33  ;;  %2356 = vmatprep.mubr.bf16.mxu1 %v2537_v34 }
  0xd1   :  { %1031 = vmatmul.mubr.bf16.gmra.mrb[72].mxu0 %v2538_v35  ;;  %2357 = vmatmul.mubr.bf16.gmra.mrb[72].mxu1 %v2539_v36 }
  0xd2   :  { %1038 = vmatprep.mubr.bf16.mxu0 %v2540_v37  ;;  %2360 = vmatprep.mubr.bf16.mxu1 %v2542_v38 }
  0xd9   :  { %1039 = vmatmul.mubr.bf16.gmra.mrb[76].mxu0 %v2543_v39  ;;  %2361 = vmatmul.mubr.bf16.gmra.mrb[76].mxu1 %v2544_v40 }
  0xda   :  { %1046 = vmatprep.mubr.bf16.mxu0 %v2545_v41  ;;  %2364 = vmatprep.mubr.bf16.mxu1 %v2547_v42 }
  0xe1   :  { %1047 = vmatmul.mubr.bf16.gmra.mrb[80].mxu0 %v2548_v43  ;;  %2365 = vmatmul.mubr.bf16.gmra.mrb[80].mxu1 %v2549_v44 }
  0xe2   :  { %1054 = vmatprep.mubr.bf16.mxu0 %v2550_v45  ;;  %2368 = vmatprep.mubr.bf16.mxu1 %v2552_v46 }
  0xe9   :  { %1055 = vmatmul.mubr.bf16.gmra.mrb[84].mxu0 %v2553_v47  ;;  %2369 = vmatmul.mubr.bf16.gmra.mrb[84].mxu1 %v2554_v48 }
  0xea   :  { %1062 = vmatprep.mubr.bf16.mxu0 %v2555_v49  ;;  %2372 = vmatprep.mubr.bf16.mxu1 %v2557_v50 }
  0xf1   :  { %1063 = vmatmul.mubr.bf16.gmra.mrb[88].mxu0 %v2558_v51  ;;  %2373 = vmatmul.mubr.bf16.gmra.mrb[88].mxu1 %v2559_v52 }
  0xf2   :  { %1070 = vmatprep.mubr.bf16.mxu0 %v2560_v53  ;;  %2376 = vmatprep.mubr.bf16.mxu1 %v2562_v54 }
  0xf9   :  { %1071 = vmatmul.mubr.bf16.gmra.mrb[92].mxu0 %v2563_v55  ;;  %2377 = vmatmul.mubr.bf16.gmra.mrb[92].mxu1 %v2564_v56 }
 0x114   :  { %v3106_v57 = vpop.f32.mrb[0].mxu0  ;;  %v3108_v58 = vpop.f32.mrb[0].mxu1 }
 0x115   :  { %v890_v59 = vpop.f32.mrb[1].mxu0  ;;  %v1082_v60 = vpop.f32.mrb[1].mxu1 }
 0x116   :  { %v3110_v61 = vpop.f32.mrb[2].mxu0  ;;  %v3112_v62 = vpop.f32.mrb[2].mxu1  ;;  %v3165_v59 = vld [vmem:[%s3393_s2] ss:$0 sm:$0xff] }
 0x117   :  { %v893_v63 = vpop.f32.mrb[3].mxu0  ;;  %v1085_v0 = vpop.f32.mrb[3].mxu1 }
 0x118   :  { %v889_v63 = vadd.f32 %v3165_v59, %v3106_v57 }
 0x11c   :  { %v896_v1 = vpop.f32.mrb[4].mxu0  ;;  %v3114_v2 = vpop.f32.mrb[4].mxu1 }
 0x11d   :  { %v898_v3 = vpop.f32.mrb[5].mxu0  ;;  %v1090_v4 = vpop.f32.mrb[5].mxu1  ;;  %v897_v60 = vadd.f32 %v3165_v59, %v896_v1 }
 0x11e   :  { %v899_v5 = vpop.f32.mrb[6].mxu0  ;;  %v3116_v6 = vpop.f32.mrb[6].mxu1 }
 0x11f   :  { %v901_v7 = vpop.f32.mrb[7].mxu0  ;;  %v1093_v8 = vpop.f32.mrb[7].mxu1  ;;  %v900_v4 = vadd.f32 %v3165_v59, %v899_v5 }
 0x124   :  { %v3118_v9 = vpop.f32.mrb[8].mxu0  ;;  %v3120_v10 = vpop.f32.mrb[8].mxu1 }
 0x125   :  { %v906_v11 = vpop.f32.mrb[9].mxu0  ;;  %v1098_v12 = vpop.f32.mrb[9].mxu1 }
 0x126   :  { %v3122_v13 = vpop.f32.mrb[10].mxu0  ;;  %v3124_v14 = vpop.f32.mrb[10].mxu1  ;;  %v892_v12 = vadd.f32 %v3165_v59, %v3110_v61 }
 0x127   :  { %v909_v15 = vpop.f32.mrb[11].mxu0  ;;  %v1101_v16 = vpop.f32.mrb[11].mxu1 }
 0x12c   :  { %v912_v17 = vpop.f32.mrb[12].mxu0  ;;  %v3126_v18 = vpop.f32.mrb[12].mxu1 }
 0x12d   :  { %v914_v19 = vpop.f32.mrb[13].mxu0  ;;  %v1106_v20 = vpop.f32.mrb[13].mxu1  ;;  %v913_v5 = vadd.f32 %v3165_v59, %v912_v17 }
 0x12e   :  { %v915_v21 = vpop.f32.mrb[14].mxu0  ;;  %v3128_v22 = vpop.f32.mrb[14].mxu1 }
 0x12f   :  { %v917_v23 = vpop.f32.mrb[15].mxu0  ;;  %v1109_v24 = vpop.f32.mrb[15].mxu1 }
 0x130   :  { %v905_v24 = vadd.f32 %v3165_v59, %v3118_v9 }
 0x134   :  { %v3130_v25 = vpop.f32.mrb[16].mxu0  ;;  %v3132_v26 = vpop.f32.mrb[16].mxu1 }
 0x135   :  { %v922_v27 = vpop.f32.mrb[17].mxu0  ;;  %v1114_v28 = vpop.f32.mrb[17].mxu1 }
 0x136   :  { %v3134_v29 = vpop.f32.mrb[18].mxu0  ;;  %v3136_v30 = vpop.f32.mrb[18].mxu1  ;;  %v916_v28 = vadd.f32 %v3165_v59, %v915_v21 }
 0x137   :  { %v925_v31 = vpop.f32.mrb[19].mxu0  ;;  %v1117_v32 = vpop.f32.mrb[19].mxu1 }
 0x13c   :  { %v3138_v33 = vpop.f32.mrb[20].mxu0  ;;  %v3140_v34 = vpop.f32.mrb[20].mxu1 }
 0x13d   :  { %v930_v35 = vpop.f32.mrb[21].mxu0  ;;  %v1122_v36 = vpop.f32.mrb[21].mxu1 }
 0x13e   :  { %v3142_v37 = vpop.f32.mrb[22].mxu0  ;;  %v3144_v38 = vpop.f32.mrb[22].mxu1  ;;  %v908_v36 = vadd.f32 %v3165_v59, %v3122_v13  ;;  %v921_v13 = vadd.f32 %v3165_v59, %v3130_v25 }
 0x13f   :  { %v933_v39 = vpop.f32.mrb[23].mxu0  ;;  %v1125_v40 = vpop.f32.mrb[23].mxu1 }
 0x144   :  { %v3146_v41 = vpop.f32.mrb[24].mxu0  ;;  %v3148_v42 = vpop.f32.mrb[24].mxu1 }
 0x145   :  { %v938_v43 = vpop.f32.mrb[25].mxu0  ;;  %v1130_v44 = vpop.f32.mrb[25].mxu1 }
 0x146   :  { %v3150_v45 = vpop.f32.mrb[26].mxu0  ;;  %v3152_v46 = vpop.f32.mrb[26].mxu1 }
 0x147   :  { %v941_v47 = vpop.f32.mrb[27].mxu0  ;;  %v1133_v48 = vpop.f32.mrb[27].mxu1 }
 0x14c   :  { %v3154_v49 = vpop.f32.mrb[28].mxu0  ;;  %v3156_v50 = vpop.f32.mrb[28].mxu1 }
 0x14d   :  { %v946_v51 = vpop.f32.mrb[29].mxu0  ;;  %v1138_v52 = vpop.f32.mrb[29].mxu1 }
 0x14e   :  { %v3158_v53 = vpop.f32.mrb[30].mxu0  ;;  %v3160_v54 = vpop.f32.mrb[30].mxu1  ;;  %v929_v52 = vadd.f32 %v3165_v59, %v3138_v33 }
 0x14f   :  { %v949_v55 = vpop.f32.mrb[31].mxu0  ;;  %v1141_v56 = vpop.f32.mrb[31].mxu1 }
 0x154   :  { %v3170_v0 = vpop.f32.mrb[32].mxu0  ;;  %v2318_v3 = vpop.f32.mrb[32].mxu1 }
 0x155   :  { %v1186_v7 = vadd.f32 %v2318_v3, %v897_v60  ;;  %v954_v8 = vpop.f32.mrb[33].mxu0  ;;  %v1177_v11 = vpop.f32.mrb[33].mxu1  ;;  %v932_v3 = vadd.f32 %v3165_v59, %v3142_v37 }
 0x156   :  { %v1178_v15 = vadd.f32 %v1177_v11, %v889_v63  ;;  %v3175_v16 = vpop.f32.mrb[34].mxu0  ;;  %v2319_v19 = vpop.f32.mrb[34].mxu1 }
 0x157   :  { %2565 = vtanh.f32 %v1186_v7  ;;  %v1189_v1 = vadd.f32 %v2319_v19, %v900_v4  ;;  %v957_v20 = vpop.f32.mrb[35].mxu0  ;;  %v1180_v23 = vpop.f32.mrb[35].mxu1 }
 0x158   :  { %2567 = vtanh.f32 %v1178_v15  ;;  %v1181_v57 = vadd.f32 %v1180_v23, %v892_v12  ;;  %v924_v12 = vadd.f32 %v3165_v59, %v3134_v29 }
 0x159   :  { %2569 = vtanh.f32 %v1189_v1 }
 0x15a   :  { %2571 = vtanh.f32 %v1181_v57 }
 0x15c   :  { %v3180_v27 = vpop.f32.mrb[36].mxu0  ;;  %v2322_v61 = vpop.f32.mrb[36].mxu1 }
 0x15d   :  { %v1202_v31 = vadd.f32 %v2322_v61, %v913_v5  ;;  %v962_v32 = vpop.f32.mrb[37].mxu0  ;;  %v1193_v35 = vpop.f32.mrb[37].mxu1  ;;  %v945_v5 = vadd.f32 %v3165_v59, %v3154_v49  ;;  %v937_v61 = vadd.f32 %v3165_v59, %v3146_v41 }
 0x15e   :  { %v1194_v39 = vadd.f32 %v1193_v35, %v905_v24  ;;  %v3185_v40 = vpop.f32.mrb[38].mxu0  ;;  %v2323_v43 = vpop.f32.mrb[38].mxu1  ;;  %v948_v35 = vadd.f32 %v3165_v59, %v3158_v53 }
 0x15f   :  { %2573 = vtanh.f32 %v1202_v31  ;;  %v1205_v17 = vadd.f32 %v2323_v43, %v916_v28  ;;  %v965_v44 = vpop.f32.mrb[39].mxu0  ;;  %v1196_v47 = vpop.f32.mrb[39].mxu1 }
 0x160   :  { %2575 = vtanh.f32 %v1194_v39  ;;  %v1197_v9 = vadd.f32 %v1196_v47, %v908_v36  ;;  %v940_v44 = vadd.f32 %v3165_v59, %v3150_v45 }
 0x161   :  { %v2566_v48 = vpop.eup %2565  ;;  %2577 = vtanh.f32 %v1205_v17 }
 0x162   :  { %v2568_v51 = vpop.eup %2567  ;;  %2579 = vtanh.f32 %v1197_v9 }
 0x163   :  { %v2570_v21 = vpop.eup %2569 }
 0x164   :  { %v2572_v55 = vpop.eup %2571  ;;  %v2077_v56 = vpack.c.bf16 %v2570_v21, %v2566_v48  ;;  %v3191_v60 = vpop.f32.mrb[40].mxu0 }
 0x165   :  { %v2326_v63 = vpop.f32.mrb[40].mxu1  ;;  %v2072_v4 = vpack.c.bf16 %v2572_v55, %v2568_v51  ;;  %v970_v8 = vpop.f32.mrb[41].mxu0  ;;  %v961_v55 = vadd.f32 %v3165_v59, %v3180_v27 }
 0x166   :  { %v1218_v7 = vadd.f32 %v2326_v63, %v929_v52  ;;  %v1209_v11 = vpop.f32.mrb[41].mxu1  ;;  %2229 = vst [vmem:[%s3394_s3 + $0x8] sm:$0xff] %v2077_v56   ;;  %v3200_v25 = vpop.f32.mrb[42].mxu0  ;;  %v953_v56 = vadd.f32 %v3165_v59, %v3170_v0 }
 0x167   :  { %v1210_v33 = vadd.f32 %v1209_v11, %v921_v13  ;;  %v2327_v15 = vpop.f32.mrb[42].mxu1  ;;  %2073 = vst [vmem:[%s3394_s3] sm:$0xff] %v2072_v4   ;;  %v973_v19 = vpop.f32.mrb[43].mxu0 }
 0x168   :  { %2581 = vtanh.f32 %v1218_v7  ;;  %v1221_v37 = vadd.f32 %v2327_v15, %v932_v3  ;;  %v1212_v1 = vpop.f32.mrb[43].mxu1  ;;  %v964_v7 = vadd.f32 %v3165_v59, %v3185_v40  ;;  %v956_v15 = vadd.f32 %v3165_v59, %v3175_v16 }
 0x169   :  { %2583 = vtanh.f32 %v1210_v33  ;;  %v1213_v20 = vadd.f32 %v1212_v1, %v924_v12  ;;  %v2574_v23 = vpop.eup %2573 }
 0x16a   :  { %2585 = vtanh.f32 %v1221_v37  ;;  %v2576_v29 = vpop.eup %2575 }
 0x16b   :  { %2587 = vtanh.f32 %v1213_v20  ;;  %v2578_v57 = vpop.eup %2577 }
 0x16c   :  { %v2580_v24 = vpop.eup %2579  ;;  %v2087_v28 = vpack.c.bf16 %v2578_v57, %v2574_v23  ;;  %v976_v31 = vpop.f32.mrb[44].mxu0 }
 0x16d   :  { %v2330_v32 = vpop.f32.mrb[44].mxu1  ;;  %v2082_v36 = vpack.c.bf16 %v2580_v24, %v2576_v29  ;;  %v978_v43 = vpop.f32.mrb[45].mxu0  ;;  %v977_v57 = vadd.f32 %v3165_v59, %v976_v31  ;;  %v969_v24 = vadd.f32 %v3165_v59, %v3191_v60 }
 0x16e   :  { %v1234_v39 = vadd.f32 %v2330_v32, %v945_v5  ;;  %v1225_v17 = vpop.f32.mrb[45].mxu1  ;;  %2231 = vst [vmem:[%s3394_s3 + $0x18] sm:$0xff] %v2087_v28   ;;  %v979_v47 = vpop.f32.mrb[46].mxu0 }
 0x16f   :  { %v1226_v49 = vadd.f32 %v1225_v17, %v937_v61  ;;  %v2331_v41 = vpop.f32.mrb[46].mxu1  ;;  %2230 = vst [vmem:[%s3394_s3 + $0x10] sm:$0xff] %v2082_v36   ;;  %v981_v9 = vpop.f32.mrb[47].mxu0 }
 0x170   :  { %2589 = vtanh.f32 %v1234_v39  ;;  %v1237_v53 = vadd.f32 %v2331_v41, %v948_v35  ;;  %v1228_v48 = vpop.f32.mrb[47].mxu1  ;;  %v980_v35 = vadd.f32 %v3165_v59, %v979_v47 }
 0x171   :  { %2591 = vtanh.f32 %v1226_v49  ;;  %v1229_v51 = vadd.f32 %v1228_v48, %v940_v44  ;;  %v972_v44 = vadd.f32 %v3165_v59, %v3200_v25 }
 0x172   :  { %v2582_v21 = vpop.eup %2581  ;;  %2593 = vtanh.f32 %v1237_v53 }
 0x173   :  { %v2584_v45 = vpop.eup %2583  ;;  %2595 = vtanh.f32 %v1229_v51 }
 0x174   :  { %v2586_v52 = vpop.eup %2585  ;;  %v984_v3 = vpop.f32.mrb[48].mxu0 }
 0x175   :  { %v2588_v13 = vpop.eup %2587  ;;  %v2097_v63 = vpack.c.bf16 %v2586_v52, %v2582_v21  ;;  %v2334_v4 = vpop.f32.mrb[48].mxu1  ;;  %v985_v52 = vadd.f32 %v3165_v59, %v984_v3 }
 0x176   :  { %v2092_v8 = vpack.c.bf16 %v2588_v13, %v2584_v45  ;;  %v1250_v11 = vadd.f32 %v2334_v4, %v961_v55  ;;  %v986_v12 = vpop.f32.mrb[49].mxu0  ;;  %v1241_v33 = vpop.f32.mrb[49].mxu1 }
 0x177   :  { %2233 = vst [vmem:[%s3394_s3 + $0x28] sm:$0xff] %v2097_v63   ;;  %v1242_v27 = vadd.f32 %v1241_v33, %v953_v56  ;;  %v987_v37 = vpop.f32.mrb[50].mxu0  ;;  %v2335_v0 = vpop.f32.mrb[50].mxu1 }
 0x178   :  { %2232 = vst [vmem:[%s3394_s3 + $0x20] sm:$0xff] %v2092_v8   ;;  %2597 = vtanh.f32 %v1250_v11  ;;  %v1253_v40 = vadd.f32 %v2335_v0, %v964_v7  ;;  %v989_v19 = vpop.f32.mrb[51].mxu0  ;;  %v1244_v1 = vpop.f32.mrb[51].mxu1  ;;  %v988_v12 = vadd.f32 %v3165_v59, %v987_v37 }
 0x179   :  { %2599 = vtanh.f32 %v1242_v27  ;;  %v1245_v20 = vadd.f32 %v1244_v1, %v956_v15 }
 0x17a   :  { %v2590_v23 = vpop.eup %2589  ;;  %2601 = vtanh.f32 %v1253_v40 }
 0x17b   :  { %v2592_v16 = vpop.eup %2591  ;;  %2603 = vtanh.f32 %v1245_v20 }
 0x17c   :  { %v2594_v29 = vpop.eup %2593  ;;  %v992_v28 = vpop.f32.mrb[52].mxu0 }
 0x17d   :  { %v2596_v5 = vpop.eup %2595  ;;  %v2107_v61 = vpack.c.bf16 %v2594_v29, %v2590_v23  ;;  %v2338_v32 = vpop.f32.mrb[52].mxu1  ;;  %v993_v21 = vadd.f32 %v3165_v59, %v992_v28 }
 0x17e   :  { %v2102_v36 = vpack.c.bf16 %v2596_v5, %v2592_v16  ;;  %v1266_v39 = vadd.f32 %v2338_v32, %v977_v57  ;;  %v994_v43 = vpop.f32.mrb[53].mxu0  ;;  %v1257_v17 = vpop.f32.mrb[53].mxu1 }
 0x17f   :  { %2235 = vst [vmem:[%s3394_s3 + $0x38] sm:$0xff] %v2107_v61   ;;  %v1258_v31 = vadd.f32 %v1257_v17, %v969_v24  ;;  %v995_v49 = vpop.f32.mrb[54].mxu0  ;;  %v2339_v41 = vpop.f32.mrb[54].mxu1 }
 0x180   :  { %2234 = vst [vmem:[%s3394_s3 + $0x30] sm:$0xff] %v2102_v36   ;;  %2605 = vtanh.f32 %v1266_v39  ;;  %v1269_v60 = vadd.f32 %v2339_v41, %v980_v35  ;;  %v997_v47 = vpop.f32.mrb[55].mxu0  ;;  %v1260_v53 = vpop.f32.mrb[55].mxu1  ;;  %v996_v4 = vadd.f32 %v3165_v59, %v995_v49 }
 0x181   :  { %2607 = vtanh.f32 %v1258_v31  ;;  %v1261_v9 = vadd.f32 %v1260_v53, %v972_v44 }
 0x182   :  { %v2598_v48 = vpop.eup %2597  ;;  %2609 = vtanh.f32 %v1269_v60 }
 0x183   :  { %v2600_v25 = vpop.eup %2599  ;;  %2611 = vtanh.f32 %v1261_v9 }
 0x184   :  { %v2602_v51 = vpop.eup %2601  ;;  %v1000_v13 = vpop.f32.mrb[56].mxu0 }
 0x185   :  { %v2604_v45 = vpop.eup %2603  ;;  %v2117_v55 = vpack.c.bf16 %v2602_v51, %v2598_v48  ;;  %v2342_v56 = vpop.f32.mrb[56].mxu1  ;;  %v1001_v29 = vadd.f32 %v3165_v59, %v1000_v13 }
 0x186   :  { %v2112_v63 = vpack.c.bf16 %v2604_v45, %v2600_v25  ;;  %v1282_v7 = vadd.f32 %v2342_v56, %v993_v21  ;;  %v1002_v8 = vpop.f32.mrb[57].mxu0  ;;  %v1273_v11 = vpop.f32.mrb[57].mxu1 }
 0x187   :  { %2237 = vst [vmem:[%s3394_s3 + $0x48] sm:$0xff] %v2117_v55   ;;  %v1274_v33 = vadd.f32 %v1273_v11, %v985_v52  ;;  %v1003_v15 = vpop.f32.mrb[58].mxu0  ;;  %v2343_v27 = vpop.f32.mrb[58].mxu1 }
 0x188   :  { %2236 = vst [vmem:[%s3394_s3 + $0x40] sm:$0xff] %v2112_v63   ;;  %2613 = vtanh.f32 %v1282_v7  ;;  %v1285_v3 = vadd.f32 %v2343_v27, %v996_v4  ;;  %v1005_v0 = vpop.f32.mrb[59].mxu0  ;;  %v1276_v40 = vpop.f32.mrb[59].mxu1  ;;  %v1004_v35 = vadd.f32 %v3165_v59, %v1003_v15 }
 0x189   :  { %2615 = vtanh.f32 %v1274_v33  ;;  %v1277_v19 = vadd.f32 %v1276_v40, %v988_v12 }
 0x18a   :  { %v2606_v1 = vpop.eup %2605  ;;  %2617 = vtanh.f32 %v1285_v3 }
 0x18b   :  { %v2608_v37 = vpop.eup %2607  ;;  %2619 = vtanh.f32 %v1277_v19 }
 0x18c   :  { %v2610_v20 = vpop.eup %2609  ;;  %v1008_v57 = vpop.f32.mrb[60].mxu0 }
 0x18d   :  { %v2612_v23 = vpop.eup %2611  ;;  %v2127_v16 = vpack.c.bf16 %v2610_v20, %v2606_v1  ;;  %v2346_v5 = vpop.f32.mrb[60].mxu1  ;;  %v1009_v61 = vadd.f32 %v3165_v59, %v1008_v57 }
 0x18e   :  { %v2122_v24 = vpack.c.bf16 %v2612_v23, %v2608_v37  ;;  %v1010_v28 = vpop.f32.mrb[61].mxu0  ;;  %v1289_v32 = vpop.f32.mrb[61].mxu1 }
 0x18f   :  { %2239 = vst [vmem:[%s3394_s3 + $0x58] sm:$0xff] %v2127_v16   ;;  %v1290_v36 = vadd.f32 %v1289_v32, %v1001_v29  ;;  %v1011_v39 = vpop.f32.mrb[62].mxu0  ;;  %v2347_v43 = vpop.f32.mrb[62].mxu1  ;;  %v1298_v17 = vadd.f32 %v2346_v5, %v1009_v61 }
 0x190   :  { %2238 = vst [vmem:[%s3394_s3 + $0x50] sm:$0xff] %v2122_v24   ;;  %v1012_v44 = vadd.f32 %v3165_v59, %v1011_v39  ;;  %v1013_v31 = vpop.f32.mrb[63].mxu0  ;;  %v1292_v49 = vpop.f32.mrb[63].mxu1 }
 0x191   :  { %2621 = vtanh.f32 %v1290_v36  ;;  %v1293_v41 = vadd.f32 %v1292_v49, %v1004_v35 }
 0x192   :  { %v2614_v60 = vpop.eup %2613  ;;  %2623 = vtanh.f32 %v1298_v17  ;;  %v1301_v47 = vadd.f32 %v2347_v43, %v1012_v44 }
 0x193   :  { %v2616_v53 = vpop.eup %2615  ;;  %2625 = vtanh.f32 %v1293_v41 }
 0x194   :  { %v2618_v9 = vpop.eup %2617  ;;  %2627 = vtanh.f32 %v1301_v47  ;;  %v1016_v51 = vpop.f32.mrb[64].mxu0 }
 0x195   :  { %v2620_v48 = vpop.eup %2619  ;;  %v2137_v25 = vpack.c.bf16 %v2618_v9, %v2614_v60  ;;  %v2350_v21 = vpop.f32.mrb[64].mxu1  ;;  %v1017_v52 = vadd.f32 %v3165_v59, %v1016_v51 }
 0x196   :  { %v2132_v45 = vpack.c.bf16 %v2620_v48, %v2616_v53  ;;  %v1018_v55 = vpop.f32.mrb[65].mxu0  ;;  %v1305_v13 = vpop.f32.mrb[65].mxu1 }
 0x197   :  { %2241 = vst [vmem:[%s3394_s3 + $0x68] sm:$0xff] %v2137_v25   ;;  %v1019_v56 = vpop.f32.mrb[66].mxu0  ;;  %v2351_v63 = vpop.f32.mrb[66].mxu1  ;;  %v1306_v4 = vadd.f32 %v1305_v13, %v1017_v52 }
 0x198   :  { %2240 = vst [vmem:[%s3394_s3 + $0x60] sm:$0xff] %v2132_v45   ;;  %v1020_v7 = vadd.f32 %v3165_v59, %v1019_v56  ;;  %v1021_v8 = vpop.f32.mrb[67].mxu0  ;;  %v1308_v11 = vpop.f32.mrb[67].mxu1 }
 0x199   :  { %2629 = vtanh.f32 %v1306_v4 }
 0x19a   :  { %v1309_v12 = vadd.f32 %v1308_v11, %v1020_v7 }
 0x19b   :  { %v2622_v33 = vpop.eup %2621 }
 0x19c   :  { %v2624_v15 = vpop.eup %2623  ;;  %2631 = vtanh.f32 %v1309_v12  ;;  %v1024_v3 = vpop.f32.mrb[68].mxu0 }
 0x19d   :  { %v2626_v27 = vpop.eup %2625  ;;  %v2354_v0 = vpop.f32.mrb[68].mxu1  ;;  %v1025_v1 = vadd.f32 %v3165_v59, %v1024_v3  ;;  %v1081_v3 = vadd.f32 %v3165_v59, %v3108_v58 }
 0x19e   :  { %v2628_v40 = vpop.eup %2627  ;;  %v2142_v19 = vpack.c.bf16 %v2626_v27, %v2622_v33  ;;  %v1026_v37 = vpop.f32.mrb[69].mxu0 }
 0x19f   :  { %v1321_v20 = vpop.f32.mrb[69].mxu1  ;;  %v2147_v23 = vpack.c.bf16 %v2628_v40, %v2624_v15  ;;  %v1027_v16 = vpop.f32.mrb[70].mxu0  ;;  %v1314_v57 = vadd.f32 %v2350_v21, %v1025_v1  ;;  %v1089_v15 = vadd.f32 %v3165_v59, %v3114_v2  ;;  %v1092_v1 = vadd.f32 %v3165_v59, %v3116_v6 }
 0x1a0   :  { %v2355_v29 = vpop.f32.mrb[70].mxu1  ;;  %2242 = vst [vmem:[%s3394_s3 + $0x70] sm:$0xff] %v2142_v19   ;;  %v1028_v5 = vadd.f32 %v3165_v59, %v1027_v16  ;;  %v1029_v24 = vpop.f32.mrb[71].mxu0 }
 0x1a1   :  { %v1324_v61 = vpop.f32.mrb[71].mxu1  ;;  %2243 = vst [vmem:[%s3394_s3 + $0x78] sm:$0xff] %v2147_v23   ;;  %2633 = vtanh.f32 %v1314_v57 }
 0x1a2   :  { %v1317_v28 = vadd.f32 %v2351_v63, %v1028_v5 }
 0x1a3   :  { %v2630_v32 = vpop.eup %2629 }
 0x1a4   :  { %2635 = vtanh.f32 %v1317_v28  ;;  %v1032_v35 = vpop.f32.mrb[72].mxu0  ;;  %v3281_v36 = vpop.f32.mrb[72].mxu1 }
 0x1a5   :  { %v1033_v43 = vadd.f32 %v3165_v59, %v1032_v35  ;;  %v1034_v17 = vpop.f32.mrb[73].mxu0  ;;  %v1337_v44 = vpop.f32.mrb[73].mxu1 }
 0x1a6   :  { %v2632_v39 = vpop.eup %2631  ;;  %v1035_v49 = vpop.f32.mrb[74].mxu0  ;;  %v1097_v17 = vadd.f32 %v3165_v59, %v3120_v10 }
 0x1a7   :  { %v2152_v31 = vpack.c.bf16 %v2632_v39, %v2630_v32  ;;  %v3284_v41 = vpop.f32.mrb[74].mxu1  ;;  %v1322_v60 = vadd.f32 %v1321_v20, %v1033_v43  ;;  %v1036_v47 = vadd.f32 %v3165_v59, %v1035_v49  ;;  %v1037_v53 = vpop.f32.mrb[75].mxu0 }
 0x1a8   :  { %v1340_v9 = vpop.f32.mrb[75].mxu1 }
 0x1a9   :  { %2244 = vst [vmem:[%s3394_s3 + $0x80] sm:$0xff] %v2152_v31   ;;  %v1325_v48 = vadd.f32 %v1324_v61, %v1036_v47  ;;  %2637 = vtanh.f32 %v1322_v60  ;;  %v1108_v60 = vadd.f32 %v3165_v59, %v3128_v22 }
 0x1ab   :  { %2639 = vtanh.f32 %v1325_v48  ;;  %v2634_v25 = vpop.eup %2633 }
 0x1ac   :  { %v1040_v51 = vpop.f32.mrb[76].mxu0  ;;  %v3290_v21 = vpop.f32.mrb[76].mxu1 }
 0x1ad   :  { %v1041_v52 = vadd.f32 %v3165_v59, %v1040_v51  ;;  %v1042_v55 = vpop.f32.mrb[77].mxu0  ;;  %v3293_v13 = vpop.f32.mrb[77].mxu1 }
 0x1ae   :  { %v2636_v45 = vpop.eup %2635  ;;  %v1043_v63 = vpop.f32.mrb[78].mxu0 }
 0x1af   :  { %v2157_v56 = vpack.c.bf16 %v2636_v45, %v2634_v25  ;;  %v3295_v4 = vpop.f32.mrb[78].mxu1  ;;  %v1330_v7 = vadd.f32 %v2354_v0, %v1041_v52  ;;  %v1044_v8 = vadd.f32 %v3165_v59, %v1043_v63  ;;  %v1045_v11 = vpop.f32.mrb[79].mxu0 }
 0x1b0   :  { %v3298_v12 = vpop.f32.mrb[79].mxu1 }
 0x1b1   :  { %2245 = vst [vmem:[%s3394_s3 + $0x88] sm:$0xff] %v2157_v56   ;;  %v1333_v33 = vadd.f32 %v2355_v29, %v1044_v8  ;;  %2641 = vtanh.f32 %v1330_v7  ;;  %v1084_v29 = vadd.f32 %v3165_v59, %v3112_v62  ;;  %v1105_v62 = vadd.f32 %v3165_v59, %v3126_v18 }
 0x1b2   :  { %v1100_v18 = vadd.f32 %v3165_v59, %v3124_v14 }
 0x1b3   :  { %2643 = vtanh.f32 %v1333_v33  ;;  %v2638_v27 = vpop.eup %2637 }
 0x1b4   :  { %v1048_v0 = vpop.f32.mrb[80].mxu0  ;;  %v2366_v40 = vpop.f32.mrb[80].mxu1 }
 0x1b5   :  { %v2640_v19 = vpop.eup %2639  ;;  %v1049_v37 = vadd.f32 %v3165_v59, %v1048_v0  ;;  %v1378_v20 = vadd.f32 %v2366_v40, %v1089_v15  ;;  %v1050_v23 = vpop.f32.mrb[81].mxu0 }
 0x1b6   :  { %v1369_v16 = vpop.f32.mrb[81].mxu1  ;;  %v2162_v2 = vpack.c.bf16 %v2640_v19, %v2638_v27  ;;  %v1051_v5 = vpop.f32.mrb[82].mxu0  ;;  %v1113_v27 = vadd.f32 %v3165_v59, %v3132_v26 }
 0x1b7   :  { %v1370_v57 = vadd.f32 %v1369_v16, %v1081_v3  ;;  %v2367_v24 = vpop.f32.mrb[82].mxu1  ;;  %v1338_v61 = vadd.f32 %v1337_v44, %v1049_v37  ;;  %2645 = vtanh.f32 %v1378_v20  ;;  %v1052_v58 = vadd.f32 %v3165_v59, %v1051_v5  ;;  %v1053_v32 = vpop.f32.mrb[83].mxu0 }
 0x1b8   :  { %v1381_v28 = vadd.f32 %v2367_v24, %v1092_v1  ;;  %v1372_v35 = vpop.f32.mrb[83].mxu1  ;;  %2246 = vst [vmem:[%s3394_s3 + $0x90] sm:$0xff] %v2162_v2   ;;  %v1116_v16 = vadd.f32 %v3165_v59, %v3136_v30 }
 0x1b9   :  { %2647 = vtanh.f32 %v1370_v57  ;;  %v1373_v6 = vadd.f32 %v1372_v35, %v1084_v29  ;;  %v1341_v39 = vadd.f32 %v1340_v9, %v1052_v58 }
 0x1ba   :  { %2649 = vtanh.f32 %v1338_v61 }
 0x1bb   :  { %2651 = vtanh.f32 %v1381_v28  ;;  %v2642_v43 = vpop.eup %2641 }
 0x1bc   :  { %2653 = vtanh.f32 %v1341_v39  ;;  %v1056_v44 = vpop.f32.mrb[84].mxu0  ;;  %v2370_v31 = vpop.f32.mrb[84].mxu1  ;;  %v1137_v39 = vadd.f32 %v3165_v59, %v3156_v50  ;;  %v1140_v50 = vadd.f32 %v3165_v59, %v3160_v54 }
 0x1bd   :  { %2655 = vtanh.f32 %v1373_v6  ;;  %v2644_v49 = vpop.eup %2643  ;;  %v1057_v47 = vadd.f32 %v3165_v59, %v1056_v44  ;;  %v1394_v53 = vadd.f32 %v2370_v31, %v1105_v62  ;;  %v1058_v9 = vpop.f32.mrb[85].mxu0 }
 0x1be   :  { %v1385_v48 = vpop.f32.mrb[85].mxu1  ;;  %v2167_v25 = vpack.c.bf16 %v2644_v49, %v2642_v43  ;;  %v1059_v45 = vpop.f32.mrb[86].mxu0  ;;  %v1129_v43 = vadd.f32 %v3165_v59, %v3148_v42 }
 0x1bf   :  { %v1386_v51 = vadd.f32 %v1385_v48, %v1097_v17  ;;  %v2371_v52 = vpop.f32.mrb[86].mxu1  ;;  %v1346_v10 = vadd.f32 %v3281_v36, %v1057_v47  ;;  %2657 = vtanh.f32 %v1394_v53  ;;  %v1060_v55 = vadd.f32 %v3165_v59, %v1059_v45  ;;  %v1061_v63 = vpop.f32.mrb[87].mxu0 }
 0x1c0   :  { %v1397_v56 = vadd.f32 %v2371_v52, %v1108_v60  ;;  %v1388_v22 = vpop.f32.mrb[87].mxu1  ;;  %2247 = vst [vmem:[%s3394_s3 + $0x98] sm:$0xff] %v2167_v25   ;;  %v1121_v36 = vadd.f32 %v3165_v59, %v3140_v34  ;;  %v1124_v34 = vadd.f32 %v3165_v59, %v3144_v38  ;;  %v1132_v48 = vadd.f32 %v3165_v59, %v3152_v46 }
 0x1c1   :  { %2659 = vtanh.f32 %v1386_v51  ;;  %v1389_v7 = vadd.f32 %v1388_v22, %v1100_v18  ;;  %v2646_v8 = vpop.eup %2645  ;;  %v1349_v14 = vadd.f32 %v3284_v41, %v1060_v55 }
 0x1c2   :  { %2661 = vtanh.f32 %v1346_v10 }
 0x1c3   :  { %v2648_v11 = vpop.eup %2647  ;;  %2663 = vtanh.f32 %v1397_v56 }
 0x1c4   :  { %v2650_v33 = vpop.eup %2649  ;;  %2665 = vtanh.f32 %v1349_v14  ;;  %v1064_v3 = vpop.f32.mrb[88].mxu0 }
 0x1c5   :  { %v2652_v15 = vpop.eup %2651  ;;  %2667 = vtanh.f32 %v1389_v7  ;;  %v2374_v0 = vpop.f32.mrb[88].mxu1  ;;  %v1065_v1 = vadd.f32 %v3165_v59, %v1064_v3 }
 0x1c6   :  { %v2654_v40 = vpop.eup %2653  ;;  %v2197_v19 = vpack.c.bf16 %v2652_v15, %v2646_v8  ;;  %v1410_v37 = vadd.f32 %v2374_v0, %v1121_v36  ;;  %v1066_v41 = vpop.f32.mrb[89].mxu0 }
 0x1c7   :  { %v1401_v20 = vpop.f32.mrb[89].mxu1  ;;  %v2656_v23 = vpop.eup %2655  ;;  %v2172_v29 = vpack.c.bf16 %v2654_v40, %v2650_v33  ;;  %v1354_v24 = vadd.f32 %v3293_v13, %v1065_v1 }
 0x1c8   :  { %v1402_v2 = vadd.f32 %v1401_v20, %v1113_v27  ;;  %v1067_v26 = vpop.f32.mrb[90].mxu0  ;;  %v2375_v57 = vpop.f32.mrb[90].mxu1  ;;  %2253 = vst [vmem:[%s3394_s3 + $0xc8] sm:$0xff] %v2197_v19   ;;  %v2192_v5 = vpack.c.bf16 %v2656_v23, %v2648_v11  ;;  %2669 = vtanh.f32 %v1410_v37 }
 0x1c9   :  { %v1068_v61 = vadd.f32 %v3165_v59, %v1067_v26  ;;  %v1069_v58 = vpop.f32.mrb[91].mxu0  ;;  %v1404_v28 = vpop.f32.mrb[91].mxu1  ;;  %2248 = vst [vmem:[%s3394_s3 + $0xa0] sm:$0xff] %v2172_v29   ;;  %v1413_v30 = vadd.f32 %v2375_v57, %v1124_v34 }
 0x1ca   :  { %2671 = vtanh.f32 %v1402_v2  ;;  %v1405_v38 = vadd.f32 %v1404_v28, %v1116_v16  ;;  %v2658_v32 = vpop.eup %2657  ;;  %2252 = vst [vmem:[%s3394_s3 + $0xc0] sm:$0xff] %v2192_v5  }
 0x1cb   :  { %2673 = vtanh.f32 %v1354_v24  ;;  %v1357_v13 = vadd.f32 %v3298_v12, %v1068_v61  ;;  %v2660_v35 = vpop.eup %2659 }
 0x1cc   :  { %2675 = vtanh.f32 %v1413_v30  ;;  %v2662_v6 = vpop.eup %2661  ;;  %v1072_v17 = vpop.f32.mrb[92].mxu0 }
 0x1cd   :  { %2677 = vtanh.f32 %v1357_v13  ;;  %v2664_v62 = vpop.eup %2663  ;;  %v2378_v44 = vpop.f32.mrb[92].mxu1  ;;  %v1073_v60 = vadd.f32 %v3165_v59, %v1072_v17 }
 0x1ce   :  { %2679 = vtanh.f32 %v1405_v38  ;;  %v2666_v31 = vpop.eup %2665  ;;  %v2207_v49 = vpack.c.bf16 %v2664_v62, %v2658_v32  ;;  %v1426_v47 = vadd.f32 %v2378_v44, %v1137_v39  ;;  %v1074_v12 = vpop.f32.mrb[93].mxu0 }
 0x1cf   :  { %v1417_v53 = vpop.f32.mrb[93].mxu1  ;;  %v2668_v9 = vpop.eup %2667  ;;  %v2177_v18 = vpack.c.bf16 %v2666_v31, %v2662_v6  ;;  %v1362_v52 = vadd.f32 %v3290_v21, %v1073_v60 }
 0x1d0   :  { %v1418_v25 = vadd.f32 %v1417_v53, %v1129_v43  ;;  %v1075_v42 = vpop.f32.mrb[94].mxu0  ;;  %v2379_v51 = vpop.f32.mrb[94].mxu1  ;;  %2255 = vst [vmem:[%s3394_s3 + $0xd8] sm:$0xff] %v2207_v49   ;;  %v2202_v45 = vpack.c.bf16 %v2668_v9, %v2660_v35  ;;  %2681 = vtanh.f32 %v1426_v47 }
 0x1d1   :  { %v1076_v10 = vadd.f32 %v3165_v59, %v1075_v42  ;;  %v1077_v55 = vpop.f32.mrb[95].mxu0  ;;  %v1420_v56 = vpop.f32.mrb[95].mxu1  ;;  %2249 = vst [vmem:[%s3394_s3 + $0xa8] sm:$0xff] %v2177_v18   ;;  %v1429_v46 = vadd.f32 %v2379_v51, %v1140_v50 }
 0x1d2   :  { %2683 = vtanh.f32 %v1418_v25  ;;  %v1421_v54 = vadd.f32 %v1420_v56, %v1132_v48  ;;  %v2670_v63 = vpop.eup %2669  ;;  %2254 = vst [vmem:[%s3394_s3 + $0xd0] sm:$0xff] %v2202_v45  }
 0x1d3   :  { %2685 = vtanh.f32 %v1362_v52  ;;  %v1365_v21 = vadd.f32 %v3295_v4, %v1076_v10 }
 0x1d4   :  { %v2672_v22 = vpop.eup %2671  ;;  %2687 = vtanh.f32 %v1429_v46 }
 0x1d5   :  { %v2674_v59 = vpop.eup %2673  ;;  %2689 = vtanh.f32 %v1365_v21 }
 0x1d6   :  { %v2676_v7 = vpop.eup %2675  ;;  %2691 = vtanh.f32 %v1421_v54 }
 0x1d7   :  { %v2678_v8 = vpop.eup %2677  ;;  %v2217_v14 = vpack.c.bf16 %v2676_v7, %v2670_v63 }
 0x1d8   :  { %v2680_v11 = vpop.eup %2679  ;;  %v2182_v33 = vpack.c.bf16 %v2678_v8, %v2674_v59 }
 0x1d9   :  { %2257 = vst [vmem:[%s3394_s3 + $0xe8] sm:$0xff] %v2217_v14   ;;  %v2212_v36 = vpack.c.bf16 %v2680_v11, %v2672_v22 }
 0x1da   :  { %2250 = vst [vmem:[%s3394_s3 + $0xb0] sm:$0xff] %v2182_v33   ;;  %v2682_v4 = vpop.eup %2681 }
 0x1db   :  { %2256 = vst [vmem:[%s3394_s3 + $0xe0] sm:$0xff] %v2212_v36  }
 0x1dc   :  { %v2684_v15 = vpop.eup %2683 }
 0x1dd   :  { %v2686_v27 = vpop.eup %2685 }
 0x1de   :  { %v2688_v3 = vpop.eup %2687 }
 0x1df   :  { %v2690_v0 = vpop.eup %2689  ;;  %v2227_v40 = vpack.c.bf16 %v2688_v3, %v2682_v4 }
 0x1e0   :  { %v2692_v19 = vpop.eup %2691  ;;  %v2187_v1 = vpack.c.bf16 %v2690_v0, %v2686_v27 }
 0x1e1   :  { %2259 = vst [vmem:[%s3394_s3 + $0xf8] sm:$0xff] %v2227_v40   ;;  %v2222_v37 = vpack.c.bf16 %v2692_v19, %v2684_v15 }
 0x1e2   :  { %2251 = vst [vmem:[%s3394_s3 + $0xb8] sm:$0xff] %v2187_v1  }
 0x1e3   :  { %2258 = vst [vmem:[%s3394_s3 + $0xf0] sm:$0xff] %v2222_v37  }

</bundles_post_ra>
